<compile_context>
chip_gen: v6e
topology: v6e:2x2x1
jax: 0.10.0
libtpu: 0.0.40
codegen_flags: <defaults>
</compile_context>

<pallas_src>
import functools

import jax
import jax.numpy as jnp
import numpy as np
from jax.experimental import pallas as pl
from jax.experimental.pallas import tpu as pltpu  # noqa: F401  (kept for TPU namespace)


# ----------------------------- small math helpers -----------------------------
def _elu(x):
    return jnp.where(x > 0, x, jnp.exp(jnp.minimum(x, 0.0)) - 1.0)


def _layernorm(x, g, b, eps=1e-5):
    mu = jnp.mean(x, axis=-1, keepdims=True)
    var = jnp.mean((x - mu) ** 2, axis=-1, keepdims=True)
    return (x - mu) * jax.lax.rsqrt(var + eps) * g + b


# --------------------------------- the kernel ---------------------------------
def _stack_kernel(
    x_ref, exog_ref,                      # [B, L], [B*S, E]
    w_f1_ref, w_f2_ref,                   # [NB, E, H], [NB, H, H]
    w_qkv_ref,                            # [NB, H, 3H]   (q columns pre-scaled)
    w_of_ref,                             # [NB, H, H]
    w_fc0_ref, w_fc1_ref,                 # [NB, L, H], [NB, H, H]
    w_fc_ref, w_bc_ref,                   # [NB, H, F], [NB, H, L]   (basis folded)
    vecs_ref,                             # [NB, 12, H]  bias / LN vectors
    c_f_ref, c_b_ref,                     # [NB, 1, F], [NB, 1, L]   (b_th folded)
    res_ref, fcst_ref,                    # outputs: [B, L], [B, F]
    *, nb, bsz, seq, hdim):

    e2d = exog_ref[...]                                        # [B*S, E]  (loaded once)
    residual = x_ref[...]                                      # [B, L]
    forecast = jnp.zeros(fcst_ref.shape, fcst_ref.dtype)

    for blk in range(nb):                                      # static unroll (NB small)
        vecs = vecs_ref[blk]                                   # [12, H]
        b_f1, b_f2 = vecs[0:1, :], vecs[1:2, :]
        ln1_g, ln1_b = vecs[2:3, :], vecs[3:4, :]
        b_q, b_k, b_v = vecs[4:5, :], vecs[5:6, :], vecs[6:7, :]
        b_of = vecs[7:8, :]
        ln2_g, ln2_b = vecs[8:9, :], vecs[9:10, :]
        b_fc0, b_fc1 = vecs[10:11, :], vecs[11:12, :]

        # --------------- TemporalGRN over exogenous variables ---------------
        h = _elu(jnp.dot(e2d, w_f1_ref[blk],
                         preferred_element_type=jnp.float32) + b_f1)        # [BS, H]
        h = jnp.dot(h, w_f2_ref[blk], preferred_element_type=jnp.float32) + b_f2
        h = _layernorm(h, ln1_g, ln1_b)                                      # [BS, H]

        qkv = jnp.dot(h, w_qkv_ref[blk],
                      preferred_element_type=jnp.float32)                    # [BS, 3H]
        q = (qkv[:, 0 * hdim:1 * hdim] + b_q).reshape(bsz, seq, hdim)
        k = (qkv[:, 1 * hdim:2 * hdim] + b_k).reshape(bsz, seq, hdim)
        v = (qkv[:, 2 * hdim:3 * hdim] + b_v).reshape(bsz, seq, hdim)

        # 1/attn_scale already folded into w_q / b_q.
        scores = jnp.einsum('bqh,bkh->bqk', q, k,
                            preferred_element_type=jnp.float32)              # [B, S, S]
        s_max = jnp.max(scores, axis=-1, keepdims=True)
        p = jnp.exp(scores - s_max)
        inv_den = pl.reciprocal(jnp.sum(p, axis=-1, keepdims=True), approx=True)
        attn = p * inv_den                                                   # [B, S, S]

        # mean_q(attn @ v) == (mean_q attn) @ v
        attn_mean = jnp.mean(attn, axis=1).reshape(bsz, 1, seq)              # [B, 1, S]
        pooled = jnp.einsum('bqk,bkh->bqh', attn_mean, v,
                            preferred_element_type=jnp.float32).reshape(bsz, hdim)

        exog_repr = _layernorm(
            jnp.dot(pooled, w_of_ref[blk],
                    preferred_element_type=jnp.float32) + b_of,
            ln2_g, ln2_b)                                                    # [B, H]

        # --------------------- NBEATS block fc_stack ---------------------
        hh = jnp.maximum(
            jnp.dot(residual, w_fc0_ref[blk],
                    preferred_element_type=jnp.float32) + b_fc0, 0.0)
        hh = jnp.maximum(
            jnp.dot(hh, w_fc1_ref[blk],
                    preferred_element_type=jnp.float32) + b_fc1, 0.0)
        hidden_act = hh + exog_repr                                          # [B, H]

        # ---------------- theta projection with folded basis ----------------
        forecast = forecast + jnp.dot(hidden_act, w_fc_ref[blk],
                                      preferred_element_type=jnp.float32) + c_f_ref[blk]
        backcast = jnp.dot(hidden_act, w_bc_ref[blk],
                           preferred_element_type=jnp.float32) + c_b_ref[blk]
        residual = residual - backcast

    res_ref[...] = residual
    fcst_ref[...] = forecast


# --------------------------------- the wrapper ---------------------------------
def _pack_params(params, f_basis, b_basis, cut, attn_scale):
    """Fold scale/basis and pack biases so the kernel sees few, contiguous arrays."""
    inv_scale = jnp.float32(1.0 / attn_scale)
    w_q = params['w_q'] * inv_scale                      # fold 1/scale into Q
    b_q = params['b_q'] * inv_scale
    w_qkv = jnp.concatenate([w_q, params['w_k'], params['w_v']], axis=-1)   # [NB,H,3H]

    # Fold polynomial basis (and b_th) into the theta projection.
    w_fc_fold = jnp.einsum('nhc,cf->nhf', params['w_th'][:, :, :cut], f_basis)  # [NB,H,F]
    w_bc_fold = jnp.einsum('nhc,cl->nhl', params['w_th'][:, :, cut:], b_basis)  # [NB,H,L]
    c_f = jnp.einsum('nic,cf->nif', params['b_th'][:, :, :cut], f_basis)        # [NB,1,F]
    c_b = jnp.einsum('nic,cl->nil', params['b_th'][:, :, cut:], b_basis)        # [NB,1,L]

    vecs = jnp.concatenate([
        params['b_f1'], params['b_f2'], params['ln1_g'], params['ln1_b'],
        b_q, params['b_k'], params['b_v'],
        params['b_of'], params['ln2_g'], params['ln2_b'],
        params['b_fc0'], params['b_fc1']], axis=1)                              # [NB,12,H]

    return dict(w_f1=params['w_f1'], w_f2=params['w_f2'], w_qkv=w_qkv,
                w_of=params['w_of'], w_fc0=params['w_fc0'], w_fc1=params['w_fc1'],
                w_fc=w_fc_fold, w_bc=w_bc_fold, vecs=vecs, c_f=c_f, c_b=c_b)


def improved_stack_forward(x, exog, params, f_basis, b_basis, *, cut, attn_scale):
    nb = params['w_f1'].shape[0]
    B, L = x.shape
    _, S, E = exog.shape
    H = params['w_f1'].shape[-1]
    F = f_basis.shape[-1]

    p = _pack_params(params, f_basis, b_basis, cut, attn_scale)
    exog2d = exog.reshape(B * S, E)

    kernel = functools.partial(_stack_kernel, nb=nb, bsz=B, seq=S, hdim=H)

    # TODO(synk): if batch grows beyond toy scale, add a 'parallel' grid axis
    # tiled over batch so v7x's second TensorCore is used.
    residual, forecast = pl.pallas_call(
        kernel,
        out_shape=[jax.ShapeDtypeStruct((B, L), jnp.float32),
                   jax.ShapeDtypeStruct((B, F), jnp.float32)],
    )(x, exog2d,
      p['w_f1'], p['w_f2'], p['w_qkv'], p['w_of'],
      p['w_fc0'], p['w_fc1'], p['w_fc'], p['w_bc'],
      p['vecs'], p['c_f'], p['c_b'])
    return residual, forecast


# ------------------------------ pure-JAX reference ------------------------------
def _reference_forward(x, exog, params, f_basis, b_basis, cut, attn_scale):
    nb = params['w_f1'].shape[0]
    residual = x
    forecast = jnp.zeros((x.shape[0], f_basis.shape[-1]), jnp.float32)
    for i in range(nb):
        p = {k: v[i] for k, v in params.items()}
        # TemporalGRN
        h = _elu(jnp.einsum('bse,eh->bsh', exog, p['w_f1']) + p['b_f1'])
        h = jnp.einsum('bsh,hk->bsk', h, p['w_f2']) + p['b_f2']
        h = _layernorm(h, p['ln1_g'], p['ln1_b'])
        q = jnp.einsum('bsh,hk->bsk', h, p['w_q']) + p['b_q']
        k = jnp.einsum('bsh,hk->bsk', h, p['w_k']) + p['b_k']
        v = jnp.einsum('bsh,hk->bsk', h, p['w_v']) + p['b_v']
        scores = jnp.einsum('bqh,bkh->bqk', q, k) / attn_scale
        attn = jax.nn.softmax(scores, axis=-1)
        ctx = jnp.einsum('bqk,bkh->bqh', attn, v)
        pooled = jnp.mean(ctx, axis=1)
        exog_repr = _layernorm(pooled @ p['w_of'] + p['b_of'],
                               p['ln2_g'], p['ln2_b'])
        # fc_stack + theta + basis
        hh = jnp.maximum(residual @ p['w_fc0'] + p['b_fc0'], 0.0)
        hh = jnp.maximum(hh @ p['w_fc1'] + p['b_fc1'], 0.0)
        theta = (hh + exog_repr) @ p['w_th'] + p['b_th']
        fc = theta[:, :cut] @ f_basis
        bc = theta[:, cut:] @ b_basis
        residual = residual - bc
        forecast = forecast + fc
    return residual, forecast


# ------------------------------------- main -------------------------------------
if __name__ == "__main__":
    # ImprovedStack(input_size=16, forecast_size=8, exog_channels=4,
    #               stack_type='trend', num_blocks=2, hidden_units=32,
    #               layers=2, degree=3, use_time_varying_exog=True)  [eval mode]
    B, L, F, E, H, S = 4, 16, 8, 4, 32, 16
    NB, LAYERS, DEGREE = 2, 2, 3
    CUT = DEGREE + 1                     # theta split (forecast coefficients)
    T = 2 * (DEGREE + 1)                 # theta_size
    ATTN_SCALE = float(np.sqrt(H))

    key = jax.random.PRNGKey(0)
    ks = iter(jax.random.split(key, 64))

    def rnd(shape, scale=0.1):
        return (scale * jax.random.normal(next(ks), shape)).astype(jnp.float32)

    params = {
        'w_f1': rnd((NB, E, H)), 'b_f1': rnd((NB, 1, H), 0.05),
        'w_f2': rnd((NB, H, H)), 'b_f2': rnd((NB, 1, H), 0.05),
        'ln1_g': 1.0 + rnd((NB, 1, H), 0.05), 'ln1_b': rnd((NB, 1, H), 0.05),
        'w_q': rnd((NB, H, H)), 'b_q': rnd((NB, 1, H), 0.05),
        'w_k': rnd((NB, H, H)), 'b_k': rnd((NB, 1, H), 0.05),
        'w_v': rnd((NB, H, H)), 'b_v': rnd((NB, 1, H), 0.05),
        'w_of': rnd((NB, H, H)), 'b_of': rnd((NB, 1, H), 0.05),
        'ln2_g': 1.0 + rnd((NB, 1, H), 0.05), 'ln2_b': rnd((NB, 1, H), 0.05),
        'w_fc0': rnd((NB, L, H)), 'b_fc0': rnd((NB, 1, H), 0.05),
        'w_fc1': rnd((NB, H, H)), 'b_fc1': rnd((NB, 1, H), 0.05),
        'w_th': rnd((NB, H, T)), 'b_th': rnd((NB, 1, T), 0.05),
    }

    # TrendBasis (polynomial) — identical for every block.
    t_b = jnp.linspace(0.0, 1.0, L)
    t_f = jnp.linspace(0.0, 1.0, F)
    b_basis = jnp.stack([t_b ** i for i in range(DEGREE + 1)], axis=0).astype(jnp.float32)  # [CUT, L]
    f_basis = jnp.stack([t_f ** i for i in range(DEGREE + 1)], axis=0).astype(jnp.float32)  # [CUT, F]

    x = jax.random.normal(next(ks), (B, L), dtype=jnp.float32)
    exog = jax.random.normal(next(ks), (B, S, E), dtype=jnp.float32)

    fwd = jax.jit(functools.partial(improved_stack_forward,
                                    cut=CUT, attn_scale=ATTN_SCALE))
    residual, forecast = fwd(x, exog, params, f_basis, b_basis)
    jax.block_until_ready((residual, forecast))

    ref_res, ref_fc = _reference_forward(
        x, exog, params, f_basis, b_basis, CUT, ATTN_SCALE)
    np.testing.assert_allclose(np.asarray(residual), np.asarray(ref_res),
                               rtol=2e-2, atol=2e-2)
    np.testing.assert_allclose(np.asarray(forecast), np.asarray(ref_fc),
                               rtol=2e-2, atol=2e-2)

    print("KERNEL_OK")
</pallas_src>

<mosaic_0001>
module attributes {stable_mosaic.version = 11 : i64} {
  func.func @_stack_kernel(%arg0: memref<4x16xf32, #tpu.memory_space<vmem>>, %arg1: memref<64x4xf32, #tpu.memory_space<vmem>>, %arg2: memref<2x4x32xf32, #tpu.memory_space<vmem>>, %arg3: memref<2x32x32xf32, #tpu.memory_space<vmem>>, %arg4: memref<2x32x96xf32, #tpu.memory_space<vmem>>, %arg5: memref<2x32x32xf32, #tpu.memory_space<vmem>>, %arg6: memref<2x16x32xf32, #tpu.memory_space<vmem>>, %arg7: memref<2x32x32xf32, #tpu.memory_space<vmem>>, %arg8: memref<2x32x8xf32, #tpu.memory_space<vmem>>, %arg9: memref<2x32x16xf32, #tpu.memory_space<vmem>>, %arg10: memref<2x12x32xf32, #tpu.memory_space<vmem>>, %arg11: memref<2x1x8xf32, #tpu.memory_space<vmem>>, %arg12: memref<2x1x16xf32, #tpu.memory_space<vmem>>, %arg13: memref<4x16xf32, #tpu.memory_space<vmem>>, %arg14: memref<4x8xf32, #tpu.memory_space<vmem>>) attributes {dimension_semantics = [], scalar_prefetch = 0 : i64, scratch_operands = 0 : i64, tpu.core_type = #tpu.core_type<tc>} {
    %c0 = arith.constant 0 : index
    %c0_0 = arith.constant 0 : index
    %0 = vector.load %arg1[%c0, %c0_0] : memref<64x4xf32, #tpu.memory_space<vmem>>, vector<64x4xf32>
    %c0_1 = arith.constant 0 : index
    %c0_2 = arith.constant 0 : index
    %1 = vector.load %arg0[%c0_1, %c0_2] : memref<4x16xf32, #tpu.memory_space<vmem>>, vector<4x16xf32>
    %cst = arith.constant 0.000000e+00 : f32
    %2 = vector.broadcast %cst : f32 to vector<4x8xf32>
    %c0_3 = arith.constant 0 : index
    %c0_4 = arith.constant 0 : index
    %c0_5 = arith.constant 0 : index
    %3 = vector.load %arg10[%c0_3, %c0_4, %c0_5] : memref<2x12x32xf32, #tpu.memory_space<vmem>>, vector<1x12x32xf32>
    %4 = vector.shape_cast %3 : vector<1x12x32xf32> to vector<12x32xf32>
    %5 = vector.extract_strided_slice %4 {offsets = [0, 0], sizes = [1, 32], strides = [1, 1]} : vector<12x32xf32> to vector<1x32xf32>
    %6 = vector.extract_strided_slice %4 {offsets = [1, 0], sizes = [1, 32], strides = [1, 1]} : vector<12x32xf32> to vector<1x32xf32>
    %7 = vector.extract_strided_slice %4 {offsets = [2, 0], sizes = [1, 32], strides = [1, 1]} : vector<12x32xf32> to vector<1x32xf32>
    %8 = vector.extract_strided_slice %4 {offsets = [3, 0], sizes = [1, 32], strides = [1, 1]} : vector<12x32xf32> to vector<1x32xf32>
    %9 = vector.extract_strided_slice %4 {offsets = [4, 0], sizes = [1, 32], strides = [1, 1]} : vector<12x32xf32> to vector<1x32xf32>
    %10 = vector.extract_strided_slice %4 {offsets = [5, 0], sizes = [1, 32], strides = [1, 1]} : vector<12x32xf32> to vector<1x32xf32>
    %11 = vector.extract_strided_slice %4 {offsets = [6, 0], sizes = [1, 32], strides = [1, 1]} : vector<12x32xf32> to vector<1x32xf32>
    %12 = vector.extract_strided_slice %4 {offsets = [7, 0], sizes = [1, 32], strides = [1, 1]} : vector<12x32xf32> to vector<1x32xf32>
    %13 = vector.extract_strided_slice %4 {offsets = [8, 0], sizes = [1, 32], strides = [1, 1]} : vector<12x32xf32> to vector<1x32xf32>
    %14 = vector.extract_strided_slice %4 {offsets = [9, 0], sizes = [1, 32], strides = [1, 1]} : vector<12x32xf32> to vector<1x32xf32>
    %15 = vector.extract_strided_slice %4 {offsets = [10, 0], sizes = [1, 32], strides = [1, 1]} : vector<12x32xf32> to vector<1x32xf32>
    %16 = vector.extract_strided_slice %4 {offsets = [11, 0], sizes = [1, 32], strides = [1, 1]} : vector<12x32xf32> to vector<1x32xf32>
    %c0_6 = arith.constant 0 : index
    %c0_7 = arith.constant 0 : index
    %c0_8 = arith.constant 0 : index
    %17 = vector.load %arg2[%c0_6, %c0_7, %c0_8] : memref<2x4x32xf32, #tpu.memory_space<vmem>>, vector<1x4x32xf32>
    %18 = vector.shape_cast %17 : vector<1x4x32xf32> to vector<4x32xf32>
    %cst_9 = arith.constant dense<0.000000e+00> : vector<64x32xf32>
    %19 = tpu.matmul %0, %18, %cst_9 {dimension_numbers = #tpu.dot_dimension_numbers<[1], [0], [0], [1], [0, 0, 1, 1], [], []>} : vector<64x4xf32>, vector<4x32xf32>, vector<64x32xf32> -> vector<64x32xf32>
    %20 = vector.broadcast %5 : vector<1x32xf32> to vector<64x32xf32>
    %21 = arith.addf %19, %20 : vector<64x32xf32>
    %cst_10 = arith.constant 0.000000e+00 : f32
    %22 = vector.broadcast %cst_10 : f32 to vector<64x32xf32>
    %23 = arith.cmpf ogt, %21, %22 : vector<64x32xf32>
    %cst_11 = arith.constant 0.000000e+00 : f32
    %24 = vector.broadcast %cst_11 : f32 to vector<64x32xf32>
    %25 = arith.minimumf %21, %24 : vector<64x32xf32>
    %26 = math.exp %25 : vector<64x32xf32>
    %cst_12 = arith.constant 1.000000e+00 : f32
    %27 = vector.broadcast %cst_12 : f32 to vector<64x32xf32>
    %28 = arith.subf %26, %27 : vector<64x32xf32>
    %29 = arith.select %23, %21, %28 : vector<64x32xi1>, vector<64x32xf32>
    %c0_13 = arith.constant 0 : index
    %c0_14 = arith.constant 0 : index
    %c0_15 = arith.constant 0 : index
    %30 = vector.load %arg3[%c0_13, %c0_14, %c0_15] : memref<2x32x32xf32, #tpu.memory_space<vmem>>, vector<1x32x32xf32>
    %31 = vector.shape_cast %30 : vector<1x32x32xf32> to vector<32x32xf32>
    %cst_16 = arith.constant dense<0.000000e+00> : vector<64x32xf32>
    %32 = tpu.matmul %29, %31, %cst_16 {dimension_numbers = #tpu.dot_dimension_numbers<[1], [0], [0], [1], [0, 0, 1, 1], [], []>} : vector<64x32xf32>, vector<32x32xf32>, vector<64x32xf32> -> vector<64x32xf32>
    %33 = vector.broadcast %6 : vector<1x32xf32> to vector<64x32xf32>
    %34 = arith.addf %32, %33 : vector<64x32xf32>
    %cst_17 = arith.constant dense<0.000000e+00> : vector<64xf32>
    %35 = vector.multi_reduction <add>, %34, %cst_17 [1] : vector<64x32xf32> to vector<64xf32>
    %36 = vector.shape_cast %35 : vector<64xf32> to vector<64x1xf32>
    %cst_18 = arith.constant 3.200000e+01 : f32
    %37 = vector.broadcast %cst_18 : f32 to vector<64x1xf32>
    %38 = arith.divf %36, %37 : vector<64x1xf32>
    %39 = vector.broadcast %38 : vector<64x1xf32> to vector<64x32xf32>
    %40 = arith.subf %34, %39 : vector<64x32xf32>
    %41 = arith.mulf %40, %40 : vector<64x32xf32>
    %cst_19 = arith.constant dense<0.000000e+00> : vector<64xf32>
    %42 = vector.multi_reduction <add>, %41, %cst_19 [1] : vector<64x32xf32> to vector<64xf32>
    %43 = vector.shape_cast %42 : vector<64xf32> to vector<64x1xf32>
    %cst_20 = arith.constant 3.200000e+01 : f32
    %44 = vector.broadcast %cst_20 : f32 to vector<64x1xf32>
    %45 = arith.divf %43, %44 : vector<64x1xf32>
    %46 = vector.broadcast %38 : vector<64x1xf32> to vector<64x32xf32>
    %47 = arith.subf %34, %46 : vector<64x32xf32>
    %cst_21 = arith.constant 9.99999974E-6 : f32
    %48 = vector.broadcast %cst_21 : f32 to vector<64x1xf32>
    %49 = arith.addf %45, %48 : vector<64x1xf32>
    %50 = math.rsqrt %49 : vector<64x1xf32>
    %51 = vector.broadcast %50 : vector<64x1xf32> to vector<64x32xf32>
    %52 = arith.mulf %47, %51 : vector<64x32xf32>
    %53 = vector.broadcast %7 : vector<1x32xf32> to vector<64x32xf32>
    %54 = arith.mulf %52, %53 : vector<64x32xf32>
    %55 = vector.broadcast %8 : vector<1x32xf32> to vector<64x32xf32>
    %56 = arith.addf %54, %55 : vector<64x32xf32>
    %c0_22 = arith.constant 0 : index
    %c0_23 = arith.constant 0 : index
    %c0_24 = arith.constant 0 : index
    %57 = vector.load %arg4[%c0_22, %c0_23, %c0_24] : memref<2x32x96xf32, #tpu.memory_space<vmem>>, vector<1x32x96xf32>
    %58 = vector.shape_cast %57 : vector<1x32x96xf32> to vector<32x96xf32>
    %cst_25 = arith.constant dense<0.000000e+00> : vector<64x96xf32>
    %59 = tpu.matmul %56, %58, %cst_25 {dimension_numbers = #tpu.dot_dimension_numbers<[1], [0], [0], [1], [0, 0, 1, 1], [], []>} : vector<64x32xf32>, vector<32x96xf32>, vector<64x96xf32> -> vector<64x96xf32>
    %60 = vector.extract_strided_slice %59 {offsets = [0, 0], sizes = [64, 32], strides = [1, 1]} : vector<64x96xf32> to vector<64x32xf32>
    %61 = vector.broadcast %9 : vector<1x32xf32> to vector<64x32xf32>
    %62 = arith.addf %60, %61 : vector<64x32xf32>
    %63 = vector.shape_cast %62 : vector<64x32xf32> to vector<4x16x32xf32>
    %64 = vector.extract_strided_slice %59 {offsets = [0, 32], sizes = [64, 32], strides = [1, 1]} : vector<64x96xf32> to vector<64x32xf32>
    %65 = vector.broadcast %10 : vector<1x32xf32> to vector<64x32xf32>
    %66 = arith.addf %64, %65 : vector<64x32xf32>
    %67 = vector.shape_cast %66 : vector<64x32xf32> to vector<4x16x32xf32>
    %68 = vector.extract_strided_slice %59 {offsets = [0, 64], sizes = [64, 32], strides = [1, 1]} : vector<64x96xf32> to vector<64x32xf32>
    %69 = vector.broadcast %11 : vector<1x32xf32> to vector<64x32xf32>
    %70 = arith.addf %68, %69 : vector<64x32xf32>
    %71 = vector.shape_cast %70 : vector<64x32xf32> to vector<4x16x32xf32>
    "tpu.trace_start"() <{level = 10 : i32, message = "bqh,bkh->bqk"}> : () -> ()
    %cst_26 = arith.constant dense<0.000000e+00> : vector<4x16x16xf32>
    %72 = tpu.matmul %63, %67, %cst_26 {dimension_numbers = #tpu.dot_dimension_numbers<[2], [2], [1], [1], [0, 0, 0, 1, 1, 1], [0], [0]>} : vector<4x16x32xf32>, vector<4x16x32xf32>, vector<4x16x16xf32> -> vector<4x16x16xf32>
    "tpu.trace_stop"() : () -> ()
    %cst_27 = arith.constant dense<0xFF800000> : vector<4x16xf32>
    %73 = vector.multi_reduction <maximumf>, %72, %cst_27 [2] : vector<4x16x16xf32> to vector<4x16xf32>
    %74 = vector.shape_cast %73 : vector<4x16xf32> to vector<4x16x1xf32>
    %75 = vector.broadcast %74 : vector<4x16x1xf32> to vector<4x16x16xf32>
    %76 = arith.subf %72, %75 : vector<4x16x16xf32>
    %77 = math.exp %76 : vector<4x16x16xf32>
    %cst_28 = arith.constant dense<0.000000e+00> : vector<4x16xf32>
    %78 = vector.multi_reduction <add>, %77, %cst_28 [2] : vector<4x16x16xf32> to vector<4x16xf32>
    %79 = vector.shape_cast %78 : vector<4x16xf32> to vector<4x16x1xf32>
    %80 = tpu.reciprocal %79 {approx = true} : vector<4x16x1xf32> -> vector<4x16x1xf32>
    %81 = vector.broadcast %80 : vector<4x16x1xf32> to vector<4x16x16xf32>
    %82 = arith.mulf %77, %81 : vector<4x16x16xf32>
    %cst_29 = arith.constant dense<0.000000e+00> : vector<4x16xf32>
    %83 = vector.multi_reduction <add>, %82, %cst_29 [1] : vector<4x16x16xf32> to vector<4x16xf32>
    %cst_30 = arith.constant 1.600000e+01 : f32
    %84 = vector.broadcast %cst_30 : f32 to vector<4x16xf32>
    %85 = arith.divf %83, %84 : vector<4x16xf32>
    %86 = vector.shape_cast %85 : vector<4x16xf32> to vector<4x1x16xf32>
    "tpu.trace_start"() <{level = 10 : i32, message = "bqk,bkh->bqh"}> : () -> ()
    %cst_31 = arith.constant dense<0.000000e+00> : vector<4x1x32xf32>
    %87 = tpu.matmul %86, %71, %cst_31 {dimension_numbers = #tpu.dot_dimension_numbers<[2], [1], [1], [2], [0, 0, 0, 1, 1, 2], [0], [0]>} : vector<4x1x16xf32>, vector<4x16x32xf32>, vector<4x1x32xf32> -> vector<4x1x32xf32>
    "tpu.trace_stop"() : () -> ()
    %88 = vector.shape_cast %87 : vector<4x1x32xf32> to vector<4x32xf32>
    %c0_32 = arith.constant 0 : index
    %c0_33 = arith.constant 0 : index
    %c0_34 = arith.constant 0 : index
    %89 = vector.load %arg5[%c0_32, %c0_33, %c0_34] : memref<2x32x32xf32, #tpu.memory_space<vmem>>, vector<1x32x32xf32>
    %90 = vector.shape_cast %89 : vector<1x32x32xf32> to vector<32x32xf32>
    %cst_35 = arith.constant dense<0.000000e+00> : vector<4x32xf32>
    %91 = tpu.matmul %88, %90, %cst_35 {dimension_numbers = #tpu.dot_dimension_numbers<[1], [0], [0], [1], [0, 0, 1, 1], [], []>} : vector<4x32xf32>, vector<32x32xf32>, vector<4x32xf32> -> vector<4x32xf32>
    %92 = vector.broadcast %12 : vector<1x32xf32> to vector<4x32xf32>
    %93 = arith.addf %91, %92 : vector<4x32xf32>
    %cst_36 = arith.constant dense<0.000000e+00> : vector<4xf32>
    %94 = vector.multi_reduction <add>, %93, %cst_36 [1] : vector<4x32xf32> to vector<4xf32>
    %95 = vector.shape_cast %94 : vector<4xf32> to vector<4x1xf32>
    %cst_37 = arith.constant 3.200000e+01 : f32
    %96 = vector.broadcast %cst_37 : f32 to vector<4x1xf32>
    %97 = arith.divf %95, %96 : vector<4x1xf32>
    %98 = vector.broadcast %97 : vector<4x1xf32> to vector<4x32xf32>
    %99 = arith.subf %93, %98 : vector<4x32xf32>
    %100 = arith.mulf %99, %99 : vector<4x32xf32>
    %cst_38 = arith.constant dense<0.000000e+00> : vector<4xf32>
    %101 = vector.multi_reduction <add>, %100, %cst_38 [1] : vector<4x32xf32> to vector<4xf32>
    %102 = vector.shape_cast %101 : vector<4xf32> to vector<4x1xf32>
    %cst_39 = arith.constant 3.200000e+01 : f32
    %103 = vector.broadcast %cst_39 : f32 to vector<4x1xf32>
    %104 = arith.divf %102, %103 : vector<4x1xf32>
    %105 = vector.broadcast %97 : vector<4x1xf32> to vector<4x32xf32>
    %106 = arith.subf %93, %105 : vector<4x32xf32>
    %cst_40 = arith.constant 9.99999974E-6 : f32
    %107 = vector.broadcast %cst_40 : f32 to vector<4x1xf32>
    %108 = arith.addf %104, %107 : vector<4x1xf32>
    %109 = math.rsqrt %108 : vector<4x1xf32>
    %110 = vector.broadcast %109 : vector<4x1xf32> to vector<4x32xf32>
    %111 = arith.mulf %106, %110 : vector<4x32xf32>
    %112 = vector.broadcast %13 : vector<1x32xf32> to vector<4x32xf32>
    %113 = arith.mulf %111, %112 : vector<4x32xf32>
    %114 = vector.broadcast %14 : vector<1x32xf32> to vector<4x32xf32>
    %115 = arith.addf %113, %114 : vector<4x32xf32>
    %c0_41 = arith.constant 0 : index
    %c0_42 = arith.constant 0 : index
    %c0_43 = arith.constant 0 : index
    %116 = vector.load %arg6[%c0_41, %c0_42, %c0_43] : memref<2x16x32xf32, #tpu.memory_space<vmem>>, vector<1x16x32xf32>
    %117 = vector.shape_cast %116 : vector<1x16x32xf32> to vector<16x32xf32>
    %cst_44 = arith.constant dense<0.000000e+00> : vector<4x32xf32>
    %118 = tpu.matmul %1, %117, %cst_44 {dimension_numbers = #tpu.dot_dimension_numbers<[1], [0], [0], [1], [0, 0, 1, 1], [], []>} : vector<4x16xf32>, vector<16x32xf32>, vector<4x32xf32> -> vector<4x32xf32>
    %119 = vector.broadcast %15 : vector<1x32xf32> to vector<4x32xf32>
    %120 = arith.addf %118, %119 : vector<4x32xf32>
    %cst_45 = arith.constant 0.000000e+00 : f32
    %121 = vector.broadcast %cst_45 : f32 to vector<4x32xf32>
    %122 = arith.maximumf %120, %121 : vector<4x32xf32>
    %c0_46 = arith.constant 0 : index
    %c0_47 = arith.constant 0 : index
    %c0_48 = arith.constant 0 : index
    %123 = vector.load %arg7[%c0_46, %c0_47, %c0_48] : memref<2x32x32xf32, #tpu.memory_space<vmem>>, vector<1x32x32xf32>
    %124 = vector.shape_cast %123 : vector<1x32x32xf32> to vector<32x32xf32>
    %cst_49 = arith.constant dense<0.000000e+00> : vector<4x32xf32>
    %125 = tpu.matmul %122, %124, %cst_49 {dimension_numbers = #tpu.dot_dimension_numbers<[1], [0], [0], [1], [0, 0, 1, 1], [], []>} : vector<4x32xf32>, vector<32x32xf32>, vector<4x32xf32> -> vector<4x32xf32>
    %126 = vector.broadcast %16 : vector<1x32xf32> to vector<4x32xf32>
    %127 = arith.addf %125, %126 : vector<4x32xf32>
    %cst_50 = arith.constant 0.000000e+00 : f32
    %128 = vector.broadcast %cst_50 : f32 to vector<4x32xf32>
    %129 = arith.maximumf %127, %128 : vector<4x32xf32>
    %130 = arith.addf %129, %115 : vector<4x32xf32>
    %c0_51 = arith.constant 0 : index
    %c0_52 = arith.constant 0 : index
    %c0_53 = arith.constant 0 : index
    %131 = vector.load %arg8[%c0_51, %c0_52, %c0_53] : memref<2x32x8xf32, #tpu.memory_space<vmem>>, vector<1x32x8xf32>
    %132 = vector.shape_cast %131 : vector<1x32x8xf32> to vector<32x8xf32>
    %cst_54 = arith.constant dense<0.000000e+00> : vector<4x8xf32>
    %133 = tpu.matmul %130, %132, %cst_54 {dimension_numbers = #tpu.dot_dimension_numbers<[1], [0], [0], [1], [0, 0, 1, 1], [], []>} : vector<4x32xf32>, vector<32x8xf32>, vector<4x8xf32> -> vector<4x8xf32>
    %134 = arith.addf %2, %133 : vector<4x8xf32>
    %c0_55 = arith.constant 0 : index
    %c0_56 = arith.constant 0 : index
    %c0_57 = arith.constant 0 : index
    %135 = vector.load %arg11[%c0_55, %c0_56, %c0_57] : memref<2x1x8xf32, #tpu.memory_space<vmem>>, vector<1x1x8xf32>
    %136 = vector.shape_cast %135 : vector<1x1x8xf32> to vector<1x8xf32>
    %137 = vector.broadcast %136 : vector<1x8xf32> to vector<4x8xf32>
    %138 = arith.addf %134, %137 : vector<4x8xf32>
    %c0_58 = arith.constant 0 : index
    %c0_59 = arith.constant 0 : index
    %c0_60 = arith.constant 0 : index
    %139 = vector.load %arg9[%c0_58, %c0_59, %c0_60] : memref<2x32x16xf32, #tpu.memory_space<vmem>>, vector<1x32x16xf32>
    %140 = vector.shape_cast %139 : vector<1x32x16xf32> to vector<32x16xf32>
    %cst_61 = arith.constant dense<0.000000e+00> : vector<4x16xf32>
    %141 = tpu.matmul %130, %140, %cst_61 {dimension_numbers = #tpu.dot_dimension_numbers<[1], [0], [0], [1], [0, 0, 1, 1], [], []>} : vector<4x32xf32>, vector<32x16xf32>, vector<4x16xf32> -> vector<4x16xf32>
    %c0_62 = arith.constant 0 : index
    %c0_63 = arith.constant 0 : index
    %c0_64 = arith.constant 0 : index
    %142 = vector.load %arg12[%c0_62, %c0_63, %c0_64] : memref<2x1x16xf32, #tpu.memory_space<vmem>>, vector<1x1x16xf32>
    %143 = vector.shape_cast %142 : vector<1x1x16xf32> to vector<1x16xf32>
    %144 = vector.broadcast %143 : vector<1x16xf32> to vector<4x16xf32>
    %145 = arith.addf %141, %144 : vector<4x16xf32>
    %146 = arith.subf %1, %145 : vector<4x16xf32>
    %c1 = arith.constant 1 : index
    %c0_65 = arith.constant 0 : index
    %c0_66 = arith.constant 0 : index
    %147 = vector.load %arg10[%c1, %c0_65, %c0_66] : memref<2x12x32xf32, #tpu.memory_space<vmem>>, vector<1x12x32xf32>
    %148 = vector.shape_cast %147 : vector<1x12x32xf32> to vector<12x32xf32>
    %149 = vector.extract_strided_slice %148 {offsets = [0, 0], sizes = [1, 32], strides = [1, 1]} : vector<12x32xf32> to vector<1x32xf32>
    %150 = vector.extract_strided_slice %148 {offsets = [1, 0], sizes = [1, 32], strides = [1, 1]} : vector<12x32xf32> to vector<1x32xf32>
    %151 = vector.extract_strided_slice %148 {offsets = [2, 0], sizes = [1, 32], strides = [1, 1]} : vector<12x32xf32> to vector<1x32xf32>
    %152 = vector.extract_strided_slice %148 {offsets = [3, 0], sizes = [1, 32], strides = [1, 1]} : vector<12x32xf32> to vector<1x32xf32>
    %153 = vector.extract_strided_slice %148 {offsets = [4, 0], sizes = [1, 32], strides = [1, 1]} : vector<12x32xf32> to vector<1x32xf32>
    %154 = vector.extract_strided_slice %148 {offsets = [5, 0], sizes = [1, 32], strides = [1, 1]} : vector<12x32xf32> to vector<1x32xf32>
    %155 = vector.extract_strided_slice %148 {offsets = [6, 0], sizes = [1, 32], strides = [1, 1]} : vector<12x32xf32> to vector<1x32xf32>
    %156 = vector.extract_strided_slice %148 {offsets = [7, 0], sizes = [1, 32], strides = [1, 1]} : vector<12x32xf32> to vector<1x32xf32>
    %157 = vector.extract_strided_slice %148 {offsets = [8, 0], sizes = [1, 32], strides = [1, 1]} : vector<12x32xf32> to vector<1x32xf32>
    %158 = vector.extract_strided_slice %148 {offsets = [9, 0], sizes = [1, 32], strides = [1, 1]} : vector<12x32xf32> to vector<1x32xf32>
    %159 = vector.extract_strided_slice %148 {offsets = [10, 0], sizes = [1, 32], strides = [1, 1]} : vector<12x32xf32> to vector<1x32xf32>
    %160 = vector.extract_strided_slice %148 {offsets = [11, 0], sizes = [1, 32], strides = [1, 1]} : vector<12x32xf32> to vector<1x32xf32>
    %c1_67 = arith.constant 1 : index
    %c0_68 = arith.constant 0 : index
    %c0_69 = arith.constant 0 : index
    %161 = vector.load %arg2[%c1_67, %c0_68, %c0_69] : memref<2x4x32xf32, #tpu.memory_space<vmem>>, vector<1x4x32xf32>
    %162 = vector.shape_cast %161 : vector<1x4x32xf32> to vector<4x32xf32>
    %cst_70 = arith.constant dense<0.000000e+00> : vector<64x32xf32>
    %163 = tpu.matmul %0, %162, %cst_70 {dimension_numbers = #tpu.dot_dimension_numbers<[1], [0], [0], [1], [0, 0, 1, 1], [], []>} : vector<64x4xf32>, vector<4x32xf32>, vector<64x32xf32> -> vector<64x32xf32>
    %164 = vector.broadcast %149 : vector<1x32xf32> to vector<64x32xf32>
    %165 = arith.addf %163, %164 : vector<64x32xf32>
    %cst_71 = arith.constant 0.000000e+00 : f32
    %166 = vector.broadcast %cst_71 : f32 to vector<64x32xf32>
    %167 = arith.cmpf ogt, %165, %166 : vector<64x32xf32>
    %cst_72 = arith.constant 0.000000e+00 : f32
    %168 = vector.broadcast %cst_72 : f32 to vector<64x32xf32>
    %169 = arith.minimumf %165, %168 : vector<64x32xf32>
    %170 = math.exp %169 : vector<64x32xf32>
    %cst_73 = arith.constant 1.000000e+00 : f32
    %171 = vector.broadcast %cst_73 : f32 to vector<64x32xf32>
    %172 = arith.subf %170, %171 : vector<64x32xf32>
    %173 = arith.select %167, %165, %172 : vector<64x32xi1>, vector<64x32xf32>
    %c1_74 = arith.constant 1 : index
    %c0_75 = arith.constant 0 : index
    %c0_76 = arith.constant 0 : index
    %174 = vector.load %arg3[%c1_74, %c0_75, %c0_76] : memref<2x32x32xf32, #tpu.memory_space<vmem>>, vector<1x32x32xf32>
    %175 = vector.shape_cast %174 : vector<1x32x32xf32> to vector<32x32xf32>
    %cst_77 = arith.constant dense<0.000000e+00> : vector<64x32xf32>
    %176 = tpu.matmul %173, %175, %cst_77 {dimension_numbers = #tpu.dot_dimension_numbers<[1], [0], [0], [1], [0, 0, 1, 1], [], []>} : vector<64x32xf32>, vector<32x32xf32>, vector<64x32xf32> -> vector<64x32xf32>
    %177 = vector.broadcast %150 : vector<1x32xf32> to vector<64x32xf32>
    %178 = arith.addf %176, %177 : vector<64x32xf32>
    %cst_78 = arith.constant dense<0.000000e+00> : vector<64xf32>
    %179 = vector.multi_reduction <add>, %178, %cst_78 [1] : vector<64x32xf32> to vector<64xf32>
    %180 = vector.shape_cast %179 : vector<64xf32> to vector<64x1xf32>
    %cst_79 = arith.constant 3.200000e+01 : f32
    %181 = vector.broadcast %cst_79 : f32 to vector<64x1xf32>
    %182 = arith.divf %180, %181 : vector<64x1xf32>
    %183 = vector.broadcast %182 : vector<64x1xf32> to vector<64x32xf32>
    %184 = arith.subf %178, %183 : vector<64x32xf32>
    %185 = arith.mulf %184, %184 : vector<64x32xf32>
    %cst_80 = arith.constant dense<0.000000e+00> : vector<64xf32>
    %186 = vector.multi_reduction <add>, %185, %cst_80 [1] : vector<64x32xf32> to vector<64xf32>
    %187 = vector.shape_cast %186 : vector<64xf32> to vector<64x1xf32>
    %cst_81 = arith.constant 3.200000e+01 : f32
    %188 = vector.broadcast %cst_81 : f32 to vector<64x1xf32>
    %189 = arith.divf %187, %188 : vector<64x1xf32>
    %190 = vector.broadcast %182 : vector<64x1xf32> to vector<64x32xf32>
    %191 = arith.subf %178, %190 : vector<64x32xf32>
    %cst_82 = arith.constant 9.99999974E-6 : f32
    %192 = vector.broadcast %cst_82 : f32 to vector<64x1xf32>
    %193 = arith.addf %189, %192 : vector<64x1xf32>
    %194 = math.rsqrt %193 : vector<64x1xf32>
    %195 = vector.broadcast %194 : vector<64x1xf32> to vector<64x32xf32>
    %196 = arith.mulf %191, %195 : vector<64x32xf32>
    %197 = vector.broadcast %151 : vector<1x32xf32> to vector<64x32xf32>
    %198 = arith.mulf %196, %197 : vector<64x32xf32>
    %199 = vector.broadcast %152 : vector<1x32xf32> to vector<64x32xf32>
    %200 = arith.addf %198, %199 : vector<64x32xf32>
    %c1_83 = arith.constant 1 : index
    %c0_84 = arith.constant 0 : index
    %c0_85 = arith.constant 0 : index
    %201 = vector.load %arg4[%c1_83, %c0_84, %c0_85] : memref<2x32x96xf32, #tpu.memory_space<vmem>>, vector<1x32x96xf32>
    %202 = vector.shape_cast %201 : vector<1x32x96xf32> to vector<32x96xf32>
    %cst_86 = arith.constant dense<0.000000e+00> : vector<64x96xf32>
    %203 = tpu.matmul %200, %202, %cst_86 {dimension_numbers = #tpu.dot_dimension_numbers<[1], [0], [0], [1], [0, 0, 1, 1], [], []>} : vector<64x32xf32>, vector<32x96xf32>, vector<64x96xf32> -> vector<64x96xf32>
    %204 = vector.extract_strided_slice %203 {offsets = [0, 0], sizes = [64, 32], strides = [1, 1]} : vector<64x96xf32> to vector<64x32xf32>
    %205 = vector.broadcast %153 : vector<1x32xf32> to vector<64x32xf32>
    %206 = arith.addf %204, %205 : vector<64x32xf32>
    %207 = vector.shape_cast %206 : vector<64x32xf32> to vector<4x16x32xf32>
    %208 = vector.extract_strided_slice %203 {offsets = [0, 32], sizes = [64, 32], strides = [1, 1]} : vector<64x96xf32> to vector<64x32xf32>
    %209 = vector.broadcast %154 : vector<1x32xf32> to vector<64x32xf32>
    %210 = arith.addf %208, %209 : vector<64x32xf32>
    %211 = vector.shape_cast %210 : vector<64x32xf32> to vector<4x16x32xf32>
    %212 = vector.extract_strided_slice %203 {offsets = [0, 64], sizes = [64, 32], strides = [1, 1]} : vector<64x96xf32> to vector<64x32xf32>
    %213 = vector.broadcast %155 : vector<1x32xf32> to vector<64x32xf32>
    %214 = arith.addf %212, %213 : vector<64x32xf32>
    %215 = vector.shape_cast %214 : vector<64x32xf32> to vector<4x16x32xf32>
    "tpu.trace_start"() <{level = 10 : i32, message = "bqh,bkh->bqk"}> : () -> ()
    %cst_87 = arith.constant dense<0.000000e+00> : vector<4x16x16xf32>
    %216 = tpu.matmul %207, %211, %cst_87 {dimension_numbers = #tpu.dot_dimension_numbers<[2], [2], [1], [1], [0, 0, 0, 1, 1, 1], [0], [0]>} : vector<4x16x32xf32>, vector<4x16x32xf32>, vector<4x16x16xf32> -> vector<4x16x16xf32>
    "tpu.trace_stop"() : () -> ()
    %cst_88 = arith.constant dense<0xFF800000> : vector<4x16xf32>
    %217 = vector.multi_reduction <maximumf>, %216, %cst_88 [2] : vector<4x16x16xf32> to vector<4x16xf32>
    %218 = vector.shape_cast %217 : vector<4x16xf32> to vector<4x16x1xf32>
    %219 = vector.broadcast %218 : vector<4x16x1xf32> to vector<4x16x16xf32>
    %220 = arith.subf %216, %219 : vector<4x16x16xf32>
    %221 = math.exp %220 : vector<4x16x16xf32>
    %cst_89 = arith.constant dense<0.000000e+00> : vector<4x16xf32>
    %222 = vector.multi_reduction <add>, %221, %cst_89 [2] : vector<4x16x16xf32> to vector<4x16xf32>
    %223 = vector.shape_cast %222 : vector<4x16xf32> to vector<4x16x1xf32>
    %224 = tpu.reciprocal %223 {approx = true} : vector<4x16x1xf32> -> vector<4x16x1xf32>
    %225 = vector.broadcast %224 : vector<4x16x1xf32> to vector<4x16x16xf32>
    %226 = arith.mulf %221, %225 : vector<4x16x16xf32>
    %cst_90 = arith.constant dense<0.000000e+00> : vector<4x16xf32>
    %227 = vector.multi_reduction <add>, %226, %cst_90 [1] : vector<4x16x16xf32> to vector<4x16xf32>
    %cst_91 = arith.constant 1.600000e+01 : f32
    %228 = vector.broadcast %cst_91 : f32 to vector<4x16xf32>
    %229 = arith.divf %227, %228 : vector<4x16xf32>
    %230 = vector.shape_cast %229 : vector<4x16xf32> to vector<4x1x16xf32>
    "tpu.trace_start"() <{level = 10 : i32, message = "bqk,bkh->bqh"}> : () -> ()
    %cst_92 = arith.constant dense<0.000000e+00> : vector<4x1x32xf32>
    %231 = tpu.matmul %230, %215, %cst_92 {dimension_numbers = #tpu.dot_dimension_numbers<[2], [1], [1], [2], [0, 0, 0, 1, 1, 2], [0], [0]>} : vector<4x1x16xf32>, vector<4x16x32xf32>, vector<4x1x32xf32> -> vector<4x1x32xf32>
    "tpu.trace_stop"() : () -> ()
    %232 = vector.shape_cast %231 : vector<4x1x32xf32> to vector<4x32xf32>
    %c1_93 = arith.constant 1 : index
    %c0_94 = arith.constant 0 : index
    %c0_95 = arith.constant 0 : index
    %233 = vector.load %arg5[%c1_93, %c0_94, %c0_95] : memref<2x32x32xf32, #tpu.memory_space<vmem>>, vector<1x32x32xf32>
    %234 = vector.shape_cast %233 : vector<1x32x32xf32> to vector<32x32xf32>
    %cst_96 = arith.constant dense<0.000000e+00> : vector<4x32xf32>
    %235 = tpu.matmul %232, %234, %cst_96 {dimension_numbers = #tpu.dot_dimension_numbers<[1], [0], [0], [1], [0, 0, 1, 1], [], []>} : vector<4x32xf32>, vector<32x32xf32>, vector<4x32xf32> -> vector<4x32xf32>
    %236 = vector.broadcast %156 : vector<1x32xf32> to vector<4x32xf32>
    %237 = arith.addf %235, %236 : vector<4x32xf32>
    %cst_97 = arith.constant dense<0.000000e+00> : vector<4xf32>
    %238 = vector.multi_reduction <add>, %237, %cst_97 [1] : vector<4x32xf32> to vector<4xf32>
    %239 = vector.shape_cast %238 : vector<4xf32> to vector<4x1xf32>
    %cst_98 = arith.constant 3.200000e+01 : f32
    %240 = vector.broadcast %cst_98 : f32 to vector<4x1xf32>
    %241 = arith.divf %239, %240 : vector<4x1xf32>
    %242 = vector.broadcast %241 : vector<4x1xf32> to vector<4x32xf32>
    %243 = arith.subf %237, %242 : vector<4x32xf32>
    %244 = arith.mulf %243, %243 : vector<4x32xf32>
    %cst_99 = arith.constant dense<0.000000e+00> : vector<4xf32>
    %245 = vector.multi_reduction <add>, %244, %cst_99 [1] : vector<4x32xf32> to vector<4xf32>
    %246 = vector.shape_cast %245 : vector<4xf32> to vector<4x1xf32>
    %cst_100 = arith.constant 3.200000e+01 : f32
    %247 = vector.broadcast %cst_100 : f32 to vector<4x1xf32>
    %248 = arith.divf %246, %247 : vector<4x1xf32>
    %249 = vector.broadcast %241 : vector<4x1xf32> to vector<4x32xf32>
    %250 = arith.subf %237, %249 : vector<4x32xf32>
    %cst_101 = arith.constant 9.99999974E-6 : f32
    %251 = vector.broadcast %cst_101 : f32 to vector<4x1xf32>
    %252 = arith.addf %248, %251 : vector<4x1xf32>
    %253 = math.rsqrt %252 : vector<4x1xf32>
    %254 = vector.broadcast %253 : vector<4x1xf32> to vector<4x32xf32>
    %255 = arith.mulf %250, %254 : vector<4x32xf32>
    %256 = vector.broadcast %157 : vector<1x32xf32> to vector<4x32xf32>
    %257 = arith.mulf %255, %256 : vector<4x32xf32>
    %258 = vector.broadcast %158 : vector<1x32xf32> to vector<4x32xf32>
    %259 = arith.addf %257, %258 : vector<4x32xf32>
    %c1_102 = arith.constant 1 : index
    %c0_103 = arith.constant 0 : index
    %c0_104 = arith.constant 0 : index
    %260 = vector.load %arg6[%c1_102, %c0_103, %c0_104] : memref<2x16x32xf32, #tpu.memory_space<vmem>>, vector<1x16x32xf32>
    %261 = vector.shape_cast %260 : vector<1x16x32xf32> to vector<16x32xf32>
    %cst_105 = arith.constant dense<0.000000e+00> : vector<4x32xf32>
    %262 = tpu.matmul %146, %261, %cst_105 {dimension_numbers = #tpu.dot_dimension_numbers<[1], [0], [0], [1], [0, 0, 1, 1], [], []>} : vector<4x16xf32>, vector<16x32xf32>, vector<4x32xf32> -> vector<4x32xf32>
    %263 = vector.broadcast %159 : vector<1x32xf32> to vector<4x32xf32>
    %264 = arith.addf %262, %263 : vector<4x32xf32>
    %cst_106 = arith.constant 0.000000e+00 : f32
    %265 = vector.broadcast %cst_106 : f32 to vector<4x32xf32>
    %266 = arith.maximumf %264, %265 : vector<4x32xf32>
    %c1_107 = arith.constant 1 : index
    %c0_108 = arith.constant 0 : index
    %c0_109 = arith.constant 0 : index
    %267 = vector.load %arg7[%c1_107, %c0_108, %c0_109] : memref<2x32x32xf32, #tpu.memory_space<vmem>>, vector<1x32x32xf32>
    %268 = vector.shape_cast %267 : vector<1x32x32xf32> to vector<32x32xf32>
    %cst_110 = arith.constant dense<0.000000e+00> : vector<4x32xf32>
    %269 = tpu.matmul %266, %268, %cst_110 {dimension_numbers = #tpu.dot_dimension_numbers<[1], [0], [0], [1], [0, 0, 1, 1], [], []>} : vector<4x32xf32>, vector<32x32xf32>, vector<4x32xf32> -> vector<4x32xf32>
    %270 = vector.broadcast %160 : vector<1x32xf32> to vector<4x32xf32>
    %271 = arith.addf %269, %270 : vector<4x32xf32>
    %cst_111 = arith.constant 0.000000e+00 : f32
    %272 = vector.broadcast %cst_111 : f32 to vector<4x32xf32>
    %273 = arith.maximumf %271, %272 : vector<4x32xf32>
    %274 = arith.addf %273, %259 : vector<4x32xf32>
    %c1_112 = arith.constant 1 : index
    %c0_113 = arith.constant 0 : index
    %c0_114 = arith.constant 0 : index
    %275 = vector.load %arg8[%c1_112, %c0_113, %c0_114] : memref<2x32x8xf32, #tpu.memory_space<vmem>>, vector<1x32x8xf32>
    %276 = vector.shape_cast %275 : vector<1x32x8xf32> to vector<32x8xf32>
    %cst_115 = arith.constant dense<0.000000e+00> : vector<4x8xf32>
    %277 = tpu.matmul %274, %276, %cst_115 {dimension_numbers = #tpu.dot_dimension_numbers<[1], [0], [0], [1], [0, 0, 1, 1], [], []>} : vector<4x32xf32>, vector<32x8xf32>, vector<4x8xf32> -> vector<4x8xf32>
    %278 = arith.addf %138, %277 : vector<4x8xf32>
    %c1_116 = arith.constant 1 : index
    %c0_117 = arith.constant 0 : index
    %c0_118 = arith.constant 0 : index
    %279 = vector.load %arg11[%c1_116, %c0_117, %c0_118] : memref<2x1x8xf32, #tpu.memory_space<vmem>>, vector<1x1x8xf32>
    %280 = vector.shape_cast %279 : vector<1x1x8xf32> to vector<1x8xf32>
    %281 = vector.broadcast %280 : vector<1x8xf32> to vector<4x8xf32>
    %282 = arith.addf %278, %281 : vector<4x8xf32>
    %c1_119 = arith.constant 1 : index
    %c0_120 = arith.constant 0 : index
    %c0_121 = arith.constant 0 : index
    %283 = vector.load %arg9[%c1_119, %c0_120, %c0_121] : memref<2x32x16xf32, #tpu.memory_space<vmem>>, vector<1x32x16xf32>
    %284 = vector.shape_cast %283 : vector<1x32x16xf32> to vector<32x16xf32>
    %cst_122 = arith.constant dense<0.000000e+00> : vector<4x16xf32>
    %285 = tpu.matmul %274, %284, %cst_122 {dimension_numbers = #tpu.dot_dimension_numbers<[1], [0], [0], [1], [0, 0, 1, 1], [], []>} : vector<4x32xf32>, vector<32x16xf32>, vector<4x16xf32> -> vector<4x16xf32>
    %c1_123 = arith.constant 1 : index
    %c0_124 = arith.constant 0 : index
    %c0_125 = arith.constant 0 : index
    %286 = vector.load %arg12[%c1_123, %c0_124, %c0_125] : memref<2x1x16xf32, #tpu.memory_space<vmem>>, vector<1x1x16xf32>
    %287 = vector.shape_cast %286 : vector<1x1x16xf32> to vector<1x16xf32>
    %288 = vector.broadcast %287 : vector<1x16xf32> to vector<4x16xf32>
    %289 = arith.addf %285, %288 : vector<4x16xf32>
    %290 = arith.subf %146, %289 : vector<4x16xf32>
    %c0_126 = arith.constant 0 : index
    %c0_127 = arith.constant 0 : index
    %291 = vector.load %arg13[%c0_126, %c0_127] : memref<4x16xf32, #tpu.memory_space<vmem>>, vector<4x16xf32>
    tpu.vector_store %arg13[%c0_126, %c0_127], %290 {strides = array<i32>} : memref<4x16xf32, #tpu.memory_space<vmem>>, vector<4x16xf32>,
    %c0_128 = arith.constant 0 : index
    %c0_129 = arith.constant 0 : index
    %292 = vector.load %arg14[%c0_128, %c0_129] : memref<4x8xf32, #tpu.memory_space<vmem>>, vector<4x8xf32>
    tpu.vector_store %arg14[%c0_128, %c0_129], %282 {strides = array<i32>} : memref<4x8xf32, #tpu.memory_space<vmem>>, vector<4x8xf32>,
    return
  }
}

</mosaic_0001>

<bundles_post_ra>
// kernel: improved_stack_forward.1
= control target key start
LH: loop header
LB: loop body
LE: loop exit
PB: predicated region body
PF: predicated region fallthrough
CT: control target
= control target key end

     0   :  { %20 = vsyncpa [#allocation3], 0  ;;  %vm89_vm0 = vcmask 1043456   ;;  %vm64_vm1 = vcmask 31744   ;;  %s5698_s0 = inlined_call_operand.vmem [shape: f32[4,16], index: 0, kind: input, shape index: {}]   ;;  %s5699_s1 = inlined_call_operand.vmem [shape: f32[64,4], index: 1, kind: input, shape index: {}]   ;;  %s5700_s2 = inlined_call_operand.vmem [shape: f32[2,4,32], index: 2, kind: input, shape index: {}]   ;;  %s5701_s3 = inlined_call_operand.vmem [shape: f32[2,32,32], index: 3, kind: input, shape index: {}]   ;;  %s5702_s4 = inlined_call_operand.vmem [shape: f32[2,32,96], index: 4, kind: input, shape index: {}]   ;;  %s5703_s5 = inlined_call_operand.vmem [shape: f32[2,32,32], index: 5, kind: input, shape index: {}]   ;;  %s5704_s6 = inlined_call_operand.vmem [shape: f32[2,16,32], index: 6, kind: input, shape index: {}]   ;;  %s5705_s7 = inlined_call_operand.vmem [shape: f32[2,32,32], index: 7, kind: input, shape index: {}]   ;;  %s5706_s8 = inlined_call_operand.vmem [shape: f32[2,32,8], index: 8, kind: input, shape index: {}]   ;;  %s5707_s9 = inlined_call_operand.vmem [shape: f32[2,32,16], index: 9, kind: input, shape index: {}]   ;;  %s5708_s10 = inlined_call_operand.vmem [shape: f32[2,12,32], index: 10, kind: input, shape index: {}]   ;;  %s5709_s11 = inlined_call_operand.vmem [shape: f32[2,1,8], index: 11, kind: input, shape index: {}]   ;;  %s5710_s12 = inlined_call_operand.vmem [shape: f32[2,1,16], index: 12, kind: input, shape index: {}]   ;;  %s5711_s13 = inlined_call_operand.hbm [shape: f32[4,16], index: 13, kind: output, shape index: {0}]   ;;  %s5712_s14 = inlined_call_operand.hbm [shape: f32[4,8], index: 14, kind: output, shape index: {1}]  }
   0x1   :  { %v59_v0 = vld [vmem:[%s5700_s2] sm:$0xf]  ;;  %v49_v3 = vld [vmem:[%s5699_s1 + $0x8] sm:$0xff]  ;;  %v50_v5 = vld [vmem:[%s5699_s1 + $0x10] sm:$0xff] }
   0x2   :  { %v48_v1 = vld [vmem:[%s5699_s1] sm:$0xff]  ;;  %4181 = vmatprep.subr.msk.mxu0 %vm89_vm0, %v59_v0  ;;  %4503 = vmatprep.subr.msk.mxu1 %vm89_vm0, %v59_v0  ;;  %v53_v4 = vld [vmem:[%s5699_s1 + $0x28] sm:$0xff]  ;;  %v54_v6 = vld [vmem:[%s5699_s1 + $0x30] sm:$0xff] }
   0x3   :  { %v52_v2 = vld [vmem:[%s5699_s1 + $0x20] sm:$0xff]  ;;  %4182 = vmatpush3.msk.msra.mxu0 %vm89_vm0, %v59_v0  ;;  %4504 = vmatpush3.msk.msra.mxu1 %vm89_vm0, %v59_v0 }
   0x4   :  { %4183 = vmatprep.mubr.msk.f32.mxu0 %vm64_vm1, %v48_v1  ;;  %4189 = vmatprep.mubr.msk.f32.mxu1 %vm64_vm1, %v52_v2 }
   0x5   :  { %21 = vsyncpa [#allocation5], 0  ;;  %4184 = vmatmul.mubr.msk.f32.vlgmr.msra.gmra.mxu0 %vm64_vm1, %v49_v3  ;;  %4190 = vmatmul.mubr.msk.f32.vlgmr.msra.gmra.mxu1 %vm64_vm1, %v53_v4  ;;  %v51_v7 = vld [vmem:[%s5699_s1 + $0x18] sm:$0xff]  ;;  %v248_v10 = vld [vmem:[%s5701_s3 + $0x10] sm:$0xff]  ;;  %v60_v13 = vlaneseq  ;;  %vm254_vm2 = vcmask 261120   ;;  %s4699_s17 = smov 32  }
   0x6   :  { %4186 = vmatprep.mubr.msk.f32.mxu0 %vm64_vm1, %v50_v5  ;;  %4192 = vmatprep.mubr.msk.f32.mxu1 %vm64_vm1, %v54_v6  ;;  %v55_v8 = vld [vmem:[%s5699_s1 + $0x38] sm:$0xff]  ;;  %v247_v11 = vld [vmem:[%s5701_s3 + $0x8] sm:$0xff]  ;;  %v246_v12 = vld [vmem:[%s5701_s3] sm:$0xff]  ;;  %s4700_s18 = smov 96   ;;  %vm1054_vm11 = vcmask 130048   ;;  %s4701_s19 = smov 64  }
   0x7   :  { %v249_v9 = vld [vmem:[%s5701_s3 + $0x18] sm:$0xff]  ;;  %v4832_v14 = vshrl.u32 %v60_v13, 7  ;;  %v4840_v16 = vld [vmem:[%s5708_s10] sm:$0xff]  ;;  %vm4703_vm12 = vmmov 0   ;;  %vm1521_vm13 = vcmask 1041409   ;;  %vm1524_vm14 = vcmask 1042434  }
   0x8   :  { %4195 = vmatprep.subr.mxu1 %v249_v9  ;;  %vm1527_vm15 = vcmask 1043459  }
   0x9   :  { %4187 = vmatmul.mubr.msk.f32.gmra.mxu0 %vm64_vm1, %v51_v7  ;;  %4193 = vmatmul.mubr.msk.f32.gmra.mxu1 %vm64_vm1, %v55_v8  ;;  %v4835_v15 = vsub.s32 0, %v4832_v14 }
   0xa   :  { %4196 = vmatpush3.msra.mxu1 %v249_v9 }
   0xb   :  { %4197 = vmatprep.subr.mxu1 %v248_v10  ;;  %v63_v17 = vrot.slane %v4840_v16, %v4835_v15 }
   0xc   :  { %4198 = vmatpush3.msra.mxu1 %v248_v10  ;;  %v4868_v10 = vsub.s32 1, %v4832_v14 }
   0xd   :  { %4199 = vmatprep.subr.mxu1 %v247_v11 }
   0xe   :  { %4200 = vmatpush3.msra.mxu1 %v247_v11 }
   0xf   :  { %4201 = vmatprep.subr.mxu1 %v246_v12 }
  0x10   :  { %4202 = vmatpush3.msra.mxu1 %v246_v12  ;;  %v253_v12 = vrot.slane %v4840_v16, %v4868_v10 }
  0xc5   :  { %v4185_v18 = vpop.f32.mrf.mxu0  ;;  %v4191_v19 = vpop.f32.mrf.mxu1 }
  0xc6   :  { %v165_v20 = vadd.f32 %v4185_v18, %v63_v17  ;;  %v4844_v24 = vadd.f32 %v4191_v19, %v63_v17 }
  0xc7   :  { %v159_v21 = vpop.f32.mrf.mxu0  ;;  %v179_v22 = vpop.f32.mrf.mxu1 }
  0xc8   :  { %v207_v23 = vmin.f32 %v165_v20, 0.0  ;;  %v160_v25 = vadd.f32 %v159_v21, %v63_v17  ;;  %v4846_v26 = vadd.f32 %v179_v22, %v63_v17  ;;  %v211_v35 = vmin.f32 %v4844_v24, 0.0 }
  0xc9   :  { %v4188_v27 = vpop.f32.mrf.mxu0  ;;  %v4194_v28 = vpop.f32.mrf.mxu1  ;;  %vm199_vm4 = vcmp.gt.f32.partialorder %v165_v20, 0.0  ;;  %vm203_vm9 = vcmp.gt.f32.partialorder %v4844_v24, 0.0 }
  0xca   :  { %v216_v29 = vmul.f32 1.442695, %v207_v23  ;;  %v175_v30 = vadd.f32 %v4188_v27, %v63_v17  ;;  %v4848_v31 = vadd.f32 %v4194_v28, %v63_v17  ;;  %v206_v32 = vmin.f32 %v160_v25, 0.0 }
  0xcb   :  { %v210_v33 = vmin.f32 %v4846_v26, 0.0  ;;  %v169_v34 = vpop.f32.mrf.mxu0  ;;  %v189_v38 = vpop.f32.mrf.mxu1  ;;  %v224_v45 = vmul.f32 1.442695, %v211_v35  ;;  %vm198_vm3 = vcmp.gt.f32.partialorder %v160_v25, 0.0  ;;  %vm202_vm7 = vcmp.gt.f32.partialorder %v4846_v26, 0.0 }
  0xcc   :  { %4512 = vpow2.f32 %v216_v29  ;;  %v209_v36 = vmin.f32 %v175_v30, 0.0  ;;  %v170_v37 = vadd.f32 %v169_v34, %v63_v17  ;;  %v214_v39 = vmul.f32 1.442695, %v206_v32 }
  0xcd   :  { %v222_v40 = vmul.f32 1.442695, %v210_v33  ;;  %v213_v43 = vmin.f32 %v4848_v31, 0.0  ;;  %v190_v44 = vadd.f32 %v189_v38, %v63_v17  ;;  %vm201_vm6 = vcmp.gt.f32.partialorder %v175_v30, 0.0 }
  0xce   :  { %v220_v41 = vmul.f32 1.442695, %v209_v36  ;;  %v208_v42 = vmin.f32 %v170_v37, 0.0  ;;  %4514 = vpow2.f32 %v214_v39  ;;  %vm200_vm5 = vcmp.gt.f32.partialorder %v170_v37, 0.0 }
  0xcf   :  { %4516 = vpow2.f32 %v222_v40  ;;  %v212_v47 = vmin.f32 %v190_v44, 0.0  ;;  %v228_v48 = vmul.f32 1.442695, %v213_v43  ;;  %vm204_vm8 = vcmp.gt.f32.partialorder %v190_v44, 0.0 }
  0xd0   :  { %v218_v46 = vmul.f32 1.442695, %v208_v42  ;;  %4518 = vpow2.f32 %v220_v41  ;;  %vm205_vm10 = vcmp.gt.f32.partialorder %v4848_v31, 0.0 }
  0xd1   :  { %v226_v49 = vmul.f32 1.442695, %v212_v47 }
  0xd2   :  { %4520 = vpow2.f32 %v218_v46 }
  0xd3   :  { %4522 = vpow2.f32 %v224_v45 }
  0xd4   :  { %4524 = vpow2.f32 %v226_v49 }
  0xd5   :  { %4526 = vpow2.f32 %v228_v48 }
  0xd9   :  { %v4513_v50 = vpop.eup %4512 }
  0xda   :  { %v3872_v52 = vadd.f32 -1.0, %v4513_v50 }
  0xdb   :  { %v4515_v51 = vpop.eup %4514 }
  0xdc   :  { %v4517_v53 = vpop.eup %4516  ;;  %v3871_v54 = vadd.f32 -1.0, %v4515_v51  ;;  %v239_v58 = vsel %vm199_vm4, %v165_v20, %v3872_v52 }
  0xdd   :  { %v4519_v55 = vpop.eup %4518  ;;  %v3875_v62 = vadd.f32 -1.0, %v4517_v53 }
  0xde   :  { %v238_v57 = vsel %vm198_vm3, %v160_v25, %v3871_v54  ;;  %v3874_v60 = vadd.f32 -1.0, %v4519_v55  ;;  %vm1601_vm3 = vcmask 257024  }
  0xdf   :  { %v4521_v56 = vpop.eup %4520  ;;  %4203 = vmatprep.mubr.msk.f32.mxu1 %vm254_vm2, %v238_v57  ;;  %v242_v5 = vsel %vm202_vm7, %v4846_v26, %v3875_v62 }
  0xe0   :  { %v3873_v59 = vadd.f32 -1.0, %v4521_v56  ;;  %v4523_v61 = vpop.eup %4522  ;;  %4204 = vmatmul.mubr.msk.f32.vlgmr.msra.gmra.mxu1 %vm254_vm2, %v239_v58  ;;  %v241_v3 = vsel %vm201_vm6, %v175_v30, %v3874_v60 }
  0xe1   :  { %v4525_v63 = vpop.eup %4524  ;;  %v3876_v4 = vadd.f32 -1.0, %v4523_v61 }
  0xe2   :  { %v240_v0 = vsel %vm200_vm5, %v170_v37, %v3873_v59  ;;  %v4527_v1 = vpop.eup %4526  ;;  %v3877_v2 = vadd.f32 -1.0, %v4525_v63 }
  0xe3   :  { %4206 = vmatprep.mubr.msk.f32.mxu1 %vm254_vm2, %v240_v0  ;;  %v3878_v6 = vadd.f32 -1.0, %v4527_v1  ;;  %v243_v8 = vsel %vm203_vm9, %v4844_v24, %v3876_v4 }
  0xe4   :  { %4207 = vmatmul.mubr.msk.f32.gmra.mxu1 %vm254_vm2, %v241_v3  ;;  %v244_v7 = vsel %vm204_vm8, %v190_v44, %v3877_v2 }
  0xe5   :  { %4209 = vmatprep.mubr.msk.f32.mxu1 %vm254_vm2, %v242_v5  ;;  %v245_v9 = vsel %vm205_vm10, %v4848_v31, %v3878_v6  ;;  %vm3832_vm10 = vcmask 60416  }
  0xe8   :  { %4210 = vmatmul.mubr.msk.f32.gmra.mxu1 %vm254_vm2, %v243_v8 }
  0xe9   :  { %4212 = vmatprep.mubr.msk.f32.mxu1 %vm254_vm2, %v244_v7 }
  0xec   :  { %4213 = vmatmul.mubr.msk.f32.gmra.mxu1 %vm254_vm2, %v245_v9 }
 0x1a0   :  { %v4205_v11 = vpop.f32.mrf.mxu1 }
 0x1a1   :  { %v351_v19 = vadd.f32 %v4205_v11, %v253_v12 }
 0x1a2   :  { %v345_v13 = vpop.f32.mrf.mxu1 }
 0x1a3   :  { %v346_v17 = vadd.f32 %v345_v13, %v253_v12  ;;  %v387_v26 = vsel %vm254_vm2, %v351_v19, 0.0 }
 0x1a4   :  { %v4208_v18 = vpop.f32.mrf.mxu1 }
 0x1a5   :  { %v384_v20 = vsel %vm254_vm2, %v346_v17, 0.0  ;;  %v361_v24 = vadd.f32 %v4208_v18, %v253_v12 }
 0x1a6   :  { %v355_v21 = vpop.f32.mrf.mxu1  ;;  %385 = vadd.xlane.f32.xlu0 %v384_v20  ;;  %v515_v20 = vld [vmem:[%s5702_s4 + $0x10] sm:$0xff] }
 0x1a7   :  { %v356_v22 = vadd.f32 %v355_v21, %v253_v12  ;;  %v393_v31 = vsel %vm254_vm2, %v361_v24, 0.0  ;;  %v514_v21 = vld [vmem:[%s5702_s4 + $0x8] sm:$0xff] }
 0x1a8   :  { %v4211_v23 = vpop.f32.mrf.mxu1 }
 0x1a9   :  { %v390_v25 = vsel %vm254_vm2, %v356_v22, 0.0  ;;  %v371_v30 = vadd.f32 %v4211_v23, %v253_v12  ;;  %v660_v23 = vsub.s32 5, %v4832_v14 }
 0x1aa   :  { %v365_v27 = vpop.f32.mrf.mxu1  ;;  %391 = vadd.xlane.f32.xlu1 %v390_v25  ;;  %388 = vadd.xlane.f32.xlu0 %v387_v26 }
 0x1ab   :  { %v366_v28 = vadd.f32 %v365_v27, %v253_v12  ;;  %v399_v36 = vsel %vm254_vm2, %v371_v30, 0.0 }
 0x1ac   :  { %v4214_v29 = vpop.f32.mrf.mxu1 }
 0x1ad   :  { %v396_v32 = vsel %vm254_vm2, %v366_v28, 0.0  ;;  %v381_v34 = vadd.f32 %v4214_v29, %v253_v12 }
 0x1ae   :  { %v375_v33 = vpop.f32.mrf.mxu1  ;;  %394 = vadd.xlane.f32.xlu1 %v393_v31  ;;  %397 = vadd.xlane.f32.xlu0 %v396_v32 }
 0x1af   :  { %v376_v35 = vadd.f32 %v375_v33, %v253_v12  ;;  %v405_v38 = vsel %vm254_vm2, %v381_v34, 0.0 }
 0x1b1   :  { %v402_v37 = vsel %vm254_vm2, %v376_v35, 0.0 }
 0x1b2   :  { %400 = vadd.xlane.f32.xlu1 %v399_v36  ;;  %403 = vadd.xlane.f32.xlu0 %v402_v37 }
 0x1b6   :  { %406 = vadd.xlane.f32.xlu1 %v405_v38 }
 0x22f   :  { %v386_v39 = vpop.xlane.xlu0 %385 }
 0x230   :  { %v409_v40 = vmul.f32 0.03125, %v386_v39 }
 0x232   :  { %v4880_v41 = vsub.f32 %v346_v17, %v409_v40 }
 0x233   :  { %v392_v42 = vpop.xlane.xlu1 %391  ;;  %v389_v43 = vpop.xlane.xlu0 %388 }
 0x234   :  { %v411_v44 = vmul.f32 0.03125, %v392_v42  ;;  %v410_v45 = vmul.f32 0.03125, %v389_v43  ;;  %v425_v46 = vmul.f32 %v4880_v41, %v4880_v41  ;;  %v4938_v43 = vsub.s32 2, %v4832_v14 }
 0x236   :  { %v4884_v47 = vsub.f32 %v356_v22, %v411_v44  ;;  %v4886_v48 = vsub.f32 %v351_v19, %v410_v45  ;;  %v433_v49 = vsel %vm254_vm2, %v425_v46, 0.0  ;;  %v516_v19 = vld [vmem:[%s5702_s4 + $0x18] sm:$0xff]  ;;  %v513_v22 = vld [vmem:[%s5702_s4] sm:$0xff] }
 0x237   :  { %v395_v50 = vpop.xlane.xlu1 %394  ;;  %434 = vadd.xlane.f32.xlu0 %v433_v49  ;;  %v398_v51 = vpop.xlane.xlu0 %397  ;;  %4215 = vmatprep.subr.mxu0 %v516_v19 }
 0x238   :  { %v412_v52 = vmul.f32 0.03125, %v395_v50  ;;  %v413_v53 = vmul.f32 0.03125, %v398_v51  ;;  %v427_v54 = vmul.f32 %v4884_v47, %v4884_v47  ;;  %v426_v55 = vmul.f32 %v4886_v48, %v4886_v48  ;;  %4216 = vmatpush3.msra.mxu0 %v516_v19 }
 0x239   :  { %4217 = vmatprep.subr.mxu0 %v515_v20  ;;  %v4941_v50 = vsub.s32 3, %v4832_v14 }
 0x23a   :  { %v4893_v56 = vsub.f32 %v361_v24, %v412_v52  ;;  %v4895_v57 = vsub.f32 %v366_v28, %v413_v53  ;;  %v439_v58 = vsel %vm254_vm2, %v427_v54, 0.0  ;;  %v436_v59 = vsel %vm254_vm2, %v426_v55, 0.0  ;;  %4218 = vmatpush3.msra.mxu0 %v515_v20 }
 0x23b   :  { %v401_v60 = vpop.xlane.xlu1 %400  ;;  %440 = vadd.xlane.f32.xlu0 %v439_v58  ;;  %437 = vadd.xlane.f32.xlu1 %v436_v59  ;;  %v404_v61 = vpop.xlane.xlu0 %403  ;;  %v661_v24 = vrot.slane %v4840_v16, %v660_v23  ;;  %v492_v52 = vrot.slane %v4840_v16, %v4938_v43  ;;  %v504_v59 = vrot.slane %v4840_v16, %v4941_v50 }
 0x23c   :  { %v414_v62 = vmul.f32 0.03125, %v401_v60  ;;  %v415_v63 = vmul.f32 0.03125, %v404_v61  ;;  %v428_v0 = vmul.f32 %v4893_v56, %v4893_v56  ;;  %v429_v1 = vmul.f32 %v4895_v57, %v4895_v57  ;;  %4219 = vmatprep.subr.mxu0 %v514_v21 }
 0x23d   :  { %4220 = vmatpush3.msra.mxu0 %v514_v21 }
 0x23e   :  { %v4903_v2 = vsub.f32 %v371_v30, %v414_v62  ;;  %v4905_v3 = vsub.f32 %v376_v35, %v415_v63  ;;  %v442_v4 = vsel %vm254_vm2, %v428_v0, 0.0  ;;  %v445_v5 = vsel %vm254_vm2, %v429_v1, 0.0  ;;  %4221 = vmatprep.subr.mxu0 %v513_v22 }
 0x23f   :  { %v407_v6 = vpop.xlane.xlu1 %406  ;;  %443 = vadd.xlane.f32.xlu1 %v442_v4  ;;  %446 = vadd.xlane.f32.xlu0 %v445_v5 }
 0x240   :  { %v416_v7 = vmul.f32 0.03125, %v407_v6  ;;  %v430_v8 = vmul.f32 %v4903_v2, %v4903_v2  ;;  %v431_v9 = vmul.f32 %v4905_v3, %v4905_v3  ;;  %4222 = vmatpush3.msra.mxu0 %v513_v22 }
 0x242   :  { %v4913_v11 = vsub.f32 %v381_v34, %v416_v7  ;;  %v448_v12 = vsel %vm254_vm2, %v430_v8, 0.0  ;;  %v451_v13 = vsel %vm254_vm2, %v431_v9, 0.0 }
 0x243   :  { %449 = vadd.xlane.f32.xlu1 %v448_v12  ;;  %452 = vadd.xlane.f32.xlu0 %v451_v13 }
 0x244   :  { %v432_v17 = vmul.f32 %v4913_v11, %v4913_v11 }
 0x246   :  { %v454_v18 = vsel %vm254_vm2, %v432_v17, 0.0 }
 0x247   :  { %455 = vadd.xlane.f32.xlu1 %v454_v18 }
 0x259   :  { %663 = vrot.lane.b32.xlu0 %v661_v24, %s4699_s17 }
 0x2c0   :  { %v435_v25 = vpop.xlane.xlu0 %434 }
 0x2c1   :  { %v457_v26 = vmul.f32 0.03125, %v435_v25 }
 0x2c3   :  { %v465_v27 = vadd.f32 1e-05, %v457_v26 }
 0x2c4   :  { %v438_v28 = vpop.xlane.xlu1 %437  ;;  %v441_v29 = vpop.xlane.xlu0 %440 }
 0x2c5   :  { %4528 = vrsqrt.f32 %v465_v27  ;;  %v458_v30 = vmul.f32 0.03125, %v438_v28  ;;  %v459_v31 = vmul.f32 0.03125, %v441_v29 }
 0x2c7   :  { %v466_v32 = vadd.f32 1e-05, %v458_v30  ;;  %v467_v33 = vadd.f32 1e-05, %v459_v31 }
 0x2c8   :  { %v444_v34 = vpop.xlane.xlu1 %443  ;;  %v447_v35 = vpop.xlane.xlu0 %446 }
 0x2c9   :  { %4530 = vrsqrt.f32 %v466_v32  ;;  %v460_v36 = vmul.f32 0.03125, %v444_v34  ;;  %v461_v37 = vmul.f32 0.03125, %v447_v35 }
 0x2ca   :  { %4532 = vrsqrt.f32 %v467_v33 }
 0x2cb   :  { %v468_v38 = vadd.f32 1e-05, %v460_v36  ;;  %v469_v39 = vadd.f32 1e-05, %v461_v37 }
 0x2cc   :  { %v450_v40 = vpop.xlane.xlu1 %449  ;;  %v453_v42 = vpop.xlane.xlu0 %452 }
 0x2cd   :  { %4534 = vrsqrt.f32 %v468_v38  ;;  %v462_v44 = vmul.f32 0.03125, %v450_v40  ;;  %v463_v45 = vmul.f32 0.03125, %v453_v42 }
 0x2ce   :  { %4536 = vrsqrt.f32 %v469_v39 }
 0x2cf   :  { %v470_v46 = vadd.f32 1e-05, %v462_v44  ;;  %v471_v49 = vadd.f32 1e-05, %v463_v45 }
 0x2d0   :  { %v456_v51 = vpop.xlane.xlu1 %455  ;;  %v664_v28 = vpop.permute.xlu0 %663 }
 0x2d1   :  { %4538 = vrsqrt.f32 %v470_v46  ;;  %v464_v53 = vmul.f32 0.03125, %v456_v51 }
 0x2d2   :  { %v4529_v54 = vpop.eup %4528  ;;  %4540 = vrsqrt.f32 %v471_v49 }
 0x2d3   :  { %v472_v55 = vadd.f32 1e-05, %v464_v53  ;;  %v481_v58 = vmul.f32 %v4529_v54, %v4880_v41 }
 0x2d5   :  { %4542 = vrsqrt.f32 %v472_v55  ;;  %v493_v60 = vmul.f32 %v492_v52, %v481_v58 }
 0x2d6   :  { %v4531_v61 = vpop.eup %4530 }
 0x2d7   :  { %v4533_v62 = vpop.eup %4532  ;;  %v482_v63 = vmul.f32 %v4531_v61, %v4886_v48  ;;  %v505_v0 = vadd.f32 %v504_v59, %v493_v60 }
 0x2d8   :  { %v483_v1 = vmul.f32 %v4533_v62, %v4884_v47 }
 0x2d9   :  { %v494_v4 = vmul.f32 %v492_v52, %v482_v63  ;;  %4223 = vmatprep.mubr.msk.f32.mxu0 %vm254_vm2, %v505_v0 }
 0x2da   :  { %v4535_v5 = vpop.eup %4534  ;;  %v495_v6 = vmul.f32 %v492_v52, %v483_v1 }
 0x2db   :  { %v4537_v7 = vpop.eup %4536  ;;  %v506_v8 = vadd.f32 %v504_v59, %v494_v4  ;;  %v484_v41 = vmul.f32 %v4535_v5, %v4893_v56 }
 0x2dc   :  { %v507_v9 = vadd.f32 %v504_v59, %v495_v6  ;;  %v485_v12 = vmul.f32 %v4537_v7, %v4895_v57 }
 0x2dd   :  { %4224 = vmatmul.mubr.msk.f32.vlgmr.msra.gmra.mxu0 %vm254_vm2, %v506_v8  ;;  %v496_v13 = vmul.f32 %v492_v52, %v484_v41 }
 0x2de   :  { %v4539_v17 = vpop.eup %4538  ;;  %4226 = vmatprep.mubr.msk.f32.mxu0 %vm254_vm2, %v507_v9  ;;  %v497_v48 = vmul.f32 %v492_v52, %v485_v12 }
 0x2df   :  { %v4541_v47 = vpop.eup %4540  ;;  %v508_v18 = vadd.f32 %v504_v59, %v496_v13  ;;  %v486_v19 = vmul.f32 %v4539_v17, %v4903_v2 }
 0x2e0   :  { %v509_v20 = vadd.f32 %v504_v59, %v497_v48  ;;  %v487_v21 = vmul.f32 %v4541_v47, %v4905_v3  ;;  %v648_v3 = vsub.s32 4, %v4832_v14 }
 0x2e1   :  { %4227 = vmatmul.mubr.msk.f32.gmra.mxu0 %vm254_vm2, %v508_v18  ;;  %v498_v56 = vmul.f32 %v492_v52, %v486_v19 }
 0x2e2   :  { %v4543_v22 = vpop.eup %4542  ;;  %4229 = vmatprep.mubr.msk.f32.mxu0 %vm254_vm2, %v509_v20  ;;  %v499_v57 = vmul.f32 %v492_v52, %v487_v21  ;;  %v4969_v30 = vrot.slane %v4840_v16, %v648_v3 }
 0x2e3   :  { %v510_v24 = vadd.f32 %v504_v59, %v498_v56  ;;  %v488_v25 = vmul.f32 %v4543_v22, %v4913_v11 }
 0x2e4   :  { %v511_v26 = vadd.f32 %v504_v59, %v499_v57  ;;  %v676_v57 = vsub.s32 6, %v4832_v14 }
 0x2e5   :  { %4230 = vmatmul.mubr.msk.f32.gmra.mxu0 %vm254_vm2, %v510_v24  ;;  %v500_v27 = vmul.f32 %v492_v52, %v488_v25 }
 0x2e6   :  { %4232 = vmatprep.mubr.msk.f32.mxu0 %vm254_vm2, %v511_v26  ;;  %v677_v24 = vrot.slane %v4840_v16, %v676_v57 }
 0x2e7   :  { %v512_v2 = vadd.f32 %v504_v59, %v500_v27 }
 0x2e9   :  { %4233 = vmatmul.mubr.msk.f32.gmra.mxu0 %vm254_vm2, %v512_v2 }
 0x39d   :  { %v4964_v29 = vpop.f32.mrf.mxu0 }
 0x39e   :  { %v667_v11 = vadd.f32 %v4964_v29, %v664_v28  ;;  %v651_v54 = vadd.f32 %v4964_v29, %v4969_v30 }
 0x39f   :  { %v4972_v31 = vpop.f32.mrf.mxu0 }
 0x3a0   :  { %v650_v32 = vadd.f32 %v4969_v30, %v4972_v31  ;;  %694 = vrot.lane.b32.xlu1 %v667_v11, %s4700_s18  ;;  %v666_v34 = vadd.f32 %v664_v28, %v4972_v31 }
 0x3a1   :  { %v4977_v33 = vpop.f32.mrf.mxu0 }
 0x3a2   :  { %4239 = vmatprep.mubr.msk.f32.mxu1 %vm254_vm2, %v650_v32  ;;  %v669_v38 = vadd.f32 %v4977_v33, %v664_v28  ;;  %v653_v62 = vadd.f32 %v4977_v33, %v4969_v30 }
 0x3a3   :  { %v4981_v35 = vpop.f32.mrf.mxu0 }
 0x3a4   :  { %v668_v36 = vadd.f32 %v664_v28, %v4981_v35  ;;  %692 = vrot.lane.b32.xlu1 %v666_v34, %s4700_s18  ;;  %v652_v55 = vadd.f32 %v4969_v30, %v4981_v35 }
 0x3a5   :  { %v4985_v37 = vpop.f32.mrf.mxu0 }
 0x3a6   :  { %783 = vrot.lane.b32.xlu0 %v668_v36, %s4700_s18  ;;  %v671_v44 = vadd.f32 %v4985_v37, %v664_v28  ;;  %v655_v4 = vadd.f32 %v4985_v37, %v4969_v30 }
 0x3a7   :  { %v4989_v39 = vpop.f32.mrf.mxu0 }
 0x3a8   :  { %v654_v40 = vadd.f32 %v4969_v30, %v4989_v39  ;;  %785 = vrot.lane.b32.xlu1 %v669_v38, %s4700_s18  ;;  %v670_v49 = vadd.f32 %v664_v28, %v4989_v39 }
 0x3a9   :  { %v4994_v42 = vpop.f32.mrf.mxu0 }
 0x3aa   :  { %v673_v45 = vadd.f32 %v4994_v42, %v664_v28  ;;  %4253 = vmatprep.mubr.msk.f32.mxu0 %vm254_vm2, %v654_v40  ;;  %v657_v5 = vadd.f32 %v4994_v42, %v4969_v30 }
 0x3ab   :  { %v4999_v46 = vpop.f32.mrf.mxu0 }
 0x3ac   :  { %967 = vrot.lane.b32.xlu0 %v673_v45, %s4700_s18  ;;  %876 = vrot.lane.b32.xlu1 %v671_v44, %s4700_s18  ;;  %v672_v51 = vadd.f32 %v664_v28, %v4999_v46  ;;  %v656_v0 = vadd.f32 %v4969_v30, %v4999_v46 }
 0x3b0   :  { %965 = vrot.lane.b32.xlu0 %v672_v51, %s4700_s18  ;;  %874 = vrot.lane.b32.xlu1 %v670_v49, %s4700_s18 }
 0x412   :  { %v695_v52 = vpop.permute.xlu1 %694 }
 0x413   :  { %4235 = vmatprep.subr.msk.mxu1 %vm254_vm2, %v695_v52 }
 0x414   :  { %4236 = vmatpush3.xpose.msk.msra.mxu1 %vm254_vm2, %v695_v52 }
 0x416   :  { %v693_v53 = vpop.permute.xlu1 %692 }
 0x417   :  { %4237 = vmatprep.subr.msk.mxu1 %vm254_vm2, %v693_v53 }
 0x418   :  { %4238 = vmatpush3.xpose.msk.msra.mxu1 %vm254_vm2, %v693_v53  ;;  %v784_v58 = vpop.permute.xlu0 %783 }
 0x41a   :  { %v786_v59 = vpop.permute.xlu1 %785 }
 0x41b   :  { %4240 = vmatmul.mubr.msk.f32.vlgmr.msra.gmra.mxu1 %vm254_vm2, %v651_v54  ;;  %4242 = vmatprep.subr.msk.mxu1 %vm254_vm2, %v786_v59 }
 0x41c   :  { %4243 = vmatpush3.xpose.msk.msra.mxu1 %vm254_vm2, %v786_v59  ;;  %4246 = vmatprep.mubr.msk.f32.mxu1 %vm254_vm2, %v652_v55 }
 0x41d   :  { %4244 = vmatprep.subr.msk.mxu1 %vm254_vm2, %v784_v58 }
 0x41e   :  { %v968_v60 = vpop.permute.xlu0 %967  ;;  %v877_v61 = vpop.permute.xlu1 %876 }
 0x41f   :  { %4249 = vmatprep.subr.msk.mxu0 %vm254_vm2, %v877_v61 }
 0x420   :  { %4245 = vmatpush3.xpose.msk.msra.mxu1 %vm254_vm2, %v784_v58  ;;  %4250 = vmatpush3.xpose.msk.msra.mxu0 %vm254_vm2, %v877_v61 }
 0x421   :  { %4256 = vmatprep.subr.msk.mxu1 %vm254_vm2, %v968_v60 }
 0x422   :  { %v875_v63 = vpop.permute.xlu1 %874  ;;  %v966_v1 = vpop.permute.xlu0 %965 }
 0x423   :  { %4247 = vmatmul.mubr.msk.f32.vlgmr.msra.gmra.mxu1 %vm254_vm2, %v653_v62  ;;  %4251 = vmatprep.subr.msk.mxu0 %vm254_vm2, %v875_v63 }
 0x424   :  { %4252 = vmatpush3.xpose.msk.msra.mxu0 %vm254_vm2, %v875_v63  ;;  %4257 = vmatpush3.xpose.msk.msra.mxu1 %vm254_vm2, %v968_v60 }
 0x425   :  { %4260 = vmatprep.mubr.msk.f32.mxu1 %vm254_vm2, %v656_v0  ;;  %4258 = vmatprep.subr.msk.mxu1 %vm254_vm2, %v966_v1 }
 0x427   :  { %4254 = vmatmul.mubr.msk.f32.vlgmr.msra.gmra.mxu0 %vm254_vm2, %v655_v4 }
 0x428   :  { %4259 = vmatpush3.xpose.msk.msra.mxu1 %vm254_vm2, %v966_v1 }
 0x42b   :  { %4261 = vmatmul.mubr.msk.f32.vlgmr.msra.gmra.mxu1 %vm254_vm2, %v657_v5 }
 0x4db   :  { %v4241_v6 = vpop.f32.mrf.mxu1 }
 0x4dc   :  { %v1058_v7 = vsel %vm1054_vm11, %v4241_v6, -inf }
 0x4dd   :  { %1059 = vmax.xlane.f32.xlu0 %v1058_v7  ;;  %v772_v8 = vpop.f32.mrf.mxu1 }
 0x4de   :  { %v1055_v41 = vsel %vm1054_vm11, %v772_v8, -inf }
 0x4df   :  { %1056 = vmax.xlane.f32.xlu1 %v1055_v41  ;;  %v4702_v41 = vmov 0.0  }
 0x4e0   :  { %4263 = vmatprep.subr.mxu0 %v4702_v41  ;;  %4277 = vmatprep.subr.mxu1 %v4702_v41 }
 0x4e1   :  { %4267 = vmatprep.mubr.msk.f32.mxu0 %vm4703_vm12, %v4702_v41  ;;  %4281 = vmatprep.mubr.msk.f32.mxu1 %vm4703_vm12, %v4702_v41 }
 0x4e3   :  { %v4248_v9 = vpop.f32.mrf.mxu1 }
 0x4e4   :  { %v1064_v12 = vsel %vm1054_vm11, %v4248_v9, -inf }
 0x4e5   :  { %1065 = vmax.xlane.f32.xlu0 %v1064_v12  ;;  %v863_v48 = vpop.f32.mrf.mxu1 }
 0x4e6   :  { %v1061_v20 = vsel %vm1054_vm11, %v863_v48, -inf }
 0x4e7   :  { %v4255_v13 = vpop.f32.mrf.mxu0 }
 0x4e8   :  { %v1070_v17 = vsel %vm1054_vm11, %v4255_v13, -inf }
 0x4e9   :  { %1071 = vmax.xlane.f32.xlu0 %v1070_v17  ;;  %v954_v47 = vpop.f32.mrf.mxu0 }
 0x4ea   :  { %v1067_v18 = vsel %vm1054_vm11, %v954_v47, -inf }
 0x4eb   :  { %v5046_v19 = vpop.f32.mrf.mxu1  ;;  %1068 = vmax.xlane.f32.xlu1 %v1067_v18 }
 0x4ec   :  { %v1076_v22 = vsel %vm1054_vm11, %v5046_v19, -inf }
 0x4ed   :  { %v5049_v21 = vpop.f32.mrf.mxu1  ;;  %1062 = vmax.xlane.f32.xlu0 %v1061_v20 }
 0x4ee   :  { %v1073_v56 = vsel %vm1054_vm11, %v5049_v21, -inf }
 0x4ef   :  { %1074 = vmax.xlane.f32.xlu1 %v1073_v56 }
 0x4f1   :  { %1077 = vmax.xlane.f32.xlu0 %v1076_v22 }
 0x500   :  { %679 = vrot.lane.b32.xlu1 %v677_v24, %s4701_s19 }
 0x566   :  { %v1060_v25 = vpop.xlane.xlu0 %1059 }
 0x567   :  { %v1080_v26 = vsub.f32 %v4241_v6, %v1060_v25 }
 0x568   :  { %v1057_v27 = vpop.xlane.xlu1 %1056 }
 0x569   :  { %v1089_v2 = vmul.f32 1.442695, %v1080_v26  ;;  %v1079_v28 = vsub.f32 %v772_v8, %v1057_v27 }
 0x56b   :  { %4544 = vpow2.f32 %v1089_v2  ;;  %v1087_v30 = vmul.f32 1.442695, %v1079_v28 }
 0x56d   :  { %4546 = vpow2.f32 %v1087_v30 }
 0x56e   :  { %v1066_v11 = vpop.xlane.xlu0 %1065 }
 0x56f   :  { %v1082_v32 = vsub.f32 %v4248_v9, %v1066_v11 }
 0x571   :  { %v1093_v34 = vmul.f32 1.442695, %v1082_v32 }
 0x572   :  { %v1072_v36 = vpop.xlane.xlu0 %1071 }
 0x573   :  { %4548 = vpow2.f32 %v1093_v34  ;;  %v1084_v40 = vsub.f32 %v4255_v13, %v1072_v36 }
 0x574   :  { %v1069_v38 = vpop.xlane.xlu1 %1068 }
 0x575   :  { %v1083_v44 = vsub.f32 %v954_v47, %v1069_v38  ;;  %v1097_v52 = vmul.f32 1.442695, %v1084_v40 }
 0x576   :  { %v1063_v16 = vpop.xlane.xlu0 %1062 }
 0x577   :  { %v1095_v45 = vmul.f32 1.442695, %v1083_v44  ;;  %v1081_v49 = vsub.f32 %v863_v48, %v1063_v16 }
 0x578   :  { %v5060_v51 = vpop.eup %4544  ;;  %v1075_v5 = vpop.xlane.xlu1 %1074 }
 0x579   :  { %4550 = vpow2.f32 %v1095_v45  ;;  %v1091_v53 = vmul.f32 1.442695, %v1081_v49  ;;  %v1106_v54 = vsel %vm1054_vm11, %v5060_v51, 0.0  ;;  %v1085_v13 = vsub.f32 %v5049_v21, %v1075_v5 }
 0x57a   :  { %v5064_v55 = vpop.eup %4546  ;;  %1107 = vadd.xlane.f32.xlu0 %v1106_v54 }
 0x57b   :  { %4552 = vpow2.f32 %v1091_v53  ;;  %v1103_v58 = vsel %vm1054_vm11, %v5064_v55, 0.0 }
 0x57c   :  { %4554 = vpow2.f32 %v1097_v52  ;;  %v680_v6 = vpop.permute.xlu1 %679 }
 0x57d   :  { %v682_v7 = vadd.f32 %v680_v6, %v4972_v31  ;;  %v688_v8 = vadd.f32 %v680_v6, %v4999_v46  ;;  %v683_v9 = vadd.f32 %v4964_v29, %v680_v6  ;;  %v685_v12 = vadd.f32 %v4977_v33, %v680_v6  ;;  %v1078_v31 = vpop.xlane.xlu0 %1077 }
 0x57e   :  { %1104 = vadd.xlane.f32.xlu0 %v1103_v58  ;;  %v1086_v46 = vsub.f32 %v5046_v19, %v1078_v31  ;;  %v1099_v29 = vmul.f32 1.442695, %v1085_v13  ;;  %v684_v19 = vadd.f32 %v680_v6, %v4981_v35  ;;  %v687_v20 = vadd.f32 %v4985_v37, %v680_v6 }
 0x57f   :  { %v689_v21 = vadd.f32 %v4994_v42, %v680_v6  ;;  %v686_v56 = vadd.f32 %v680_v6, %v4989_v39 }
 0x580   :  { %v5068_v59 = vpop.eup %4548  ;;  %v1101_v17 = vmul.f32 1.442695, %v1086_v46 }
 0x581   :  { %v1112_v60 = vsel %vm1054_vm11, %v5068_v59, 0.0 }
 0x582   :  { %1113 = vadd.xlane.f32.xlu0 %v1112_v60  ;;  %4556 = vpow2.f32 %v1101_v17 }
 0x583   :  { %4558 = vpow2.f32 %v1099_v29 }
 0x586   :  { %v5072_v61 = vpop.eup %4550 }
 0x587   :  { %v1115_v62 = vsel %vm1054_vm11, %v5072_v61, 0.0 }
 0x588   :  { %v5076_v63 = vpop.eup %4552  ;;  %1116 = vadd.xlane.f32.xlu1 %v1115_v62 }
 0x589   :  { %v1109_v0 = vsel %vm1054_vm11, %v5076_v63, 0.0  ;;  %v5080_v1 = vpop.eup %4554 }
 0x58a   :  { %1110 = vadd.xlane.f32.xlu0 %v1109_v0  ;;  %v1118_v4 = vsel %vm1054_vm11, %v5080_v1, 0.0 }
 0x58e   :  { %1119 = vadd.xlane.f32.xlu0 %v1118_v4 }
 0x58f   :  { %v5100_v48 = vpop.eup %4556 }
 0x590   :  { %v1124_v33 = vsel %vm1054_vm11, %v5100_v48, 0.0  ;;  %v5104_v47 = vpop.eup %4558 }
 0x591   :  { %v1121_v18 = vsel %vm1054_vm11, %v5104_v47, 0.0 }
 0x599   :  { %1186 = vrot.lane.b32.xlu1 %v682_v7, %s4701_s19 }
 0x59d   :  { %1429 = vrot.lane.b32.xlu1 %v688_v8, %s4701_s19 }
 0x5a4   :  { %1188 = vrot.lane.b32.xlu0 %v683_v9, %s4701_s19 }
 0x5a8   :  { %1269 = vrot.lane.b32.xlu0 %v685_v12, %s4701_s19 }
 0x5c7   :  { %1125 = vadd.xlane.f32.xlu0 %v1124_v33 }
 0x5cb   :  { %1122 = vadd.xlane.f32.xlu0 %v1121_v18 }
 0x5e1   :  { %1267 = vrot.lane.b32.xlu0 %v684_v19, %s4701_s19 }
 0x5e5   :  { %1350 = vrot.lane.b32.xlu0 %v687_v20, %s4701_s19 }
 0x5e9   :  { %1431 = vrot.lane.b32.xlu0 %v689_v21, %s4701_s19 }
 0x5ed   :  { %1348 = vrot.lane.b32.xlu0 %v686_v56, %s4701_s19 }
 0x603   :  { %v1108_v22 = vpop.xlane.xlu0 %1107 }
 0x604   :  { %4560 = vrcp.f32 %v1108_v22 }
 0x607   :  { %v1105_v24 = vpop.xlane.xlu0 %1104 }
 0x608   :  { %4562 = vrcp.f32 %v1105_v24 }
 0x60b   :  { %v1114_v25 = vpop.xlane.xlu0 %1113 }
 0x611   :  { %v4561_v35 = vpop.eup %4560  ;;  %v1117_v28 = vpop.xlane.xlu1 %1116 }
 0x612   :  { %v1136_v27 = vmul.f32 %v4561_v35, %v5060_v51 }
 0x613   :  { %v1111_v26 = vpop.xlane.xlu0 %1110 }
 0x614   :  { %v1144_v30 = vsel %vm1054_vm11, %v1136_v27, 0.0  ;;  %4564 = vrcp.f32 %v1111_v26 }
 0x615   :  { %v4563_v37 = vpop.eup %4562  ;;  %v1187_v36 = vpop.permute.xlu1 %1186  ;;  %4566 = vrcp.f32 %v1114_v25 }
 0x616   :  { %v1135_v2 = vmul.f32 %v4563_v37, %v5064_v55 }
 0x617   :  { %v1120_v42 = vpop.xlane.xlu0 %1119 }
 0x618   :  { %v1143_v39 = vsel %vm1054_vm11, %v1135_v2, 0.0  ;;  %4568 = vrcp.f32 %v1120_v42 }
 0x619   :  { %v1145_v11 = vadd.f32 %v1144_v30, %v1143_v39  ;;  %4570 = vrcp.f32 %v1117_v28  ;;  %v1430_v27 = vpop.permute.xlu1 %1429 }
 0x61b   :  { %v1189_v32 = vpop.permute.xlu0 %1188  ;;  %v1146_v34 = vrot.slane %v1145_v11, 4 }
 0x61c   :  { %4264 = vmatpush3.msra.mxu0 %v1189_v32 }
 0x61d   :  { %4265 = vmatprep.subr.mxu0 %v4702_v41  ;;  %v1147_v38 = vadd.f32 %v1146_v34, %v1145_v11 }
 0x61e   :  { %4266 = vmatpush3.msra.mxu0 %v1187_v36 }
 0x61f   :  { %4270 = vmatprep.subr.mxu0 %v4702_v41  ;;  %v1148_v40 = vrot.slane %v1147_v38, 2  ;;  %v1270_v51 = vpop.permute.xlu0 %1269 }
 0x621   :  { %v1149_v44 = vadd.f32 %v1148_v40, %v1147_v38  ;;  %v4565_v52 = vpop.eup %4564  ;;  %v1511_v40 = vld [vmem:[%s5703_s5 + $0x18] sm:$0xff] }
 0x622   :  { %v4567_v53 = vpop.eup %4566  ;;  %v1137_v54 = vmul.f32 %v4565_v52, %v5076_v63  ;;  %v56_v52 = vld [vmem:[%s5698_s0] sm:$0xf] }
 0x623   :  { %v1150_v16 = vrot.slane %v1149_v44, 1  ;;  %v1138_v55 = vmul.f32 %v4567_v53, %v5068_v59 }
 0x624   :  { %v1152_v58 = vsel %vm1054_vm11, %v1137_v54, 0.0 }
 0x625   :  { %v1151_v45 = vadd.f32 %v1150_v16, %v1149_v44  ;;  %v1153_v60 = vsel %vm1054_vm11, %v1138_v55, 0.0  ;;  %v4569_v0 = vpop.eup %4568  ;;  %v1510_v44 = vld [vmem:[%s5703_s5 + $0x10] sm:$0xff]  ;;  %v1509_v16 = vld [vmem:[%s5703_s5 + $0x8] sm:$0xff] }
 0x626   :  { %v1154_v62 = vadd.f32 %v1153_v60, %v1152_v58  ;;  %v4571_v4 = vpop.eup %4570  ;;  %v1140_v6 = vmul.f32 %v4569_v0, %v5080_v1 }
 0x627   :  { %v1180_v49 = vmul.f32 0.0625, %v1151_v45  ;;  %v1139_v7 = vmul.f32 %v4571_v4, %v5072_v61  ;;  %v1508_v45 = vld [vmem:[%s5703_s5] sm:$0xff] }
 0x628   :  { %v1155_v5 = vrot.slane %v1154_v62, 4  ;;  %v1162_v9 = vsel %vm1054_vm11, %v1140_v6, 0.0 }
 0x629   :  { %4268 = vmatmul.mubr.msk.f32.vlgmr.msra.gmra.mxu0 %vm1054_vm11, %v1180_v49  ;;  %v1161_v12 = vsel %vm1054_vm11, %v1139_v7, 0.0  ;;  %v1626_v49 = vld [vmem:[%s5704_s6 + $0x8] sm:$0xff] }
 0x62a   :  { %4271 = vmatpush3.msra.mxu0 %v1270_v51  ;;  %4274 = vmatprep.mubr.msk.f32.mxu0 %vm4703_vm12, %v4702_v41  ;;  %v1156_v8 = vadd.f32 %v1155_v5, %v1154_v62  ;;  %v1163_v63 = vadd.f32 %v1162_v9, %v1161_v12  ;;  %v1625_v51 = vld [vmem:[%s5704_s6] sm:$0xff] }
 0x62b   :  { %4272 = vmatprep.subr.mxu0 %v4702_v41 }
 0x62c   :  { %v1157_v31 = vrot.slane %v1156_v8, 2  ;;  %v1164_v46 = vrot.slane %v1163_v63, 4 }
 0x62e   :  { %v1158_v59 = vadd.f32 %v1157_v31, %v1156_v8  ;;  %v1165_v29 = vadd.f32 %v1164_v46, %v1163_v63  ;;  %v1708_v63 = vld [vmem:[%s5705_s7 + $0x18] sm:$0xff]  ;;  %v5194_v31 = vld [vmem:[%s5708_s10 + $0x8] sm:$0xf]  ;;  %v1707_v46 = vld [vmem:[%s5705_s7 + $0x10] sm:$0xff] }
 0x630   :  { %v1159_v17 = vrot.slane %v1158_v59, 1  ;;  %v1166_v19 = vrot.slane %v1165_v29, 2 }
 0x632   :  { %v1160_v18 = vadd.f32 %v1159_v17, %v1158_v59  ;;  %v1167_v61 = vadd.f32 %v1166_v19, %v1165_v29  ;;  %v1706_v17 = vld [vmem:[%s5705_s7 + $0x8] sm:$0xff] }
 0x634   :  { %v1181_v20 = vmul.f32 0.0625, %v1160_v18  ;;  %v1168_v56 = vrot.slane %v1167_v61, 1  ;;  %v1705_v18 = vld [vmem:[%s5705_s7] sm:$0xff] }
 0x636   :  { %v1169_v25 = vadd.f32 %v1168_v56, %v1167_v61 }
 0x638   :  { %v1182_v28 = vmul.f32 0.0625, %v1169_v25 }
 0x650   :  { %v1126_v13 = vpop.xlane.xlu0 %1125 }
 0x651   :  { %4572 = vrcp.f32 %v1126_v13  ;;  %v1630_v13 = vrot.slane %v5194_v31, %v4938_v43 }
 0x654   :  { %v1123_v33 = vpop.xlane.xlu0 %1122 }
 0x655   :  { %4574 = vrcp.f32 %v1123_v33 }
 0x658   :  { %v1268_v1 = vpop.permute.xlu0 %1267 }
 0x659   :  { %4273 = vmatpush3.msra.mxu0 %v1268_v1  ;;  %v1514_v1 = vsub.s32 7, %v4832_v14  ;;  %v4002_v14 = vld [vmem:[%s5706_s8 + $0x38] sm:$0xff] }
 0x65a   :  { %4275 = vmatmul.mubr.msk.f32.vlgmr.msra.gmra.mxu0 %vm1054_vm11, %v1181_v20  ;;  %4284 = vmatprep.subr.mxu0 %v4702_v41  ;;  %v4644_v20 = vld [vmem:[%s5708_s10] sm:$0xff] }
 0x65b   :  { %4288 = vmatprep.mubr.msk.f32.mxu0 %vm4703_vm12, %v4702_v41  ;;  %v1515_v61 = vrot.slane %v4644_v20, %v1514_v1 }
 0x65c   :  { %v1351_v21 = vpop.permute.xlu0 %1350 }
 0x65d   :  { %4278 = vmatpush3.msra.mxu1 %v1351_v21 }
 0x65e   :  { %v4573_v22 = vpop.eup %4572  ;;  %4279 = vmatprep.subr.mxu1 %v4702_v41 }
 0x65f   :  { %v1142_v35 = vmul.f32 %v4573_v22, %v5100_v48 }
 0x660   :  { %v1432_v24 = vpop.permute.xlu0 %1431 }
 0x661   :  { %4285 = vmatpush3.msra.mxu0 %v1432_v24  ;;  %v1171_v42 = vsel %vm1054_vm11, %v1142_v35, 0.0 }
 0x662   :  { %v4575_v26 = vpop.eup %4574  ;;  %4286 = vmatprep.subr.mxu0 %v4702_v41 }
 0x663   :  { %v1141_v37 = vmul.f32 %v4575_v26, %v5104_v47  ;;  %4287 = vmatpush3.msra.mxu0 %v1430_v27 }
 0x664   :  { %v1349_v2 = vpop.permute.xlu0 %1348  ;;  %4302 = vmatprep.subr.mxu0 %v4702_v41 }
 0x665   :  { %v1170_v30 = vsel %vm1054_vm11, %v1141_v37, 0.0  ;;  %4280 = vmatpush3.msra.mxu1 %v1349_v2 }
 0x666   :  { %v1172_v39 = vadd.f32 %v1171_v42, %v1170_v30  ;;  %4282 = vmatmul.mubr.msk.f32.vlgmr.msra.gmra.mxu1 %vm1054_vm11, %v1182_v28  ;;  %4291 = vmatprep.subr.mxu1 %v4702_v41  ;;  %v1791_v28 = vld [vmem:[%s5706_s8 + $0x18] sm:$0xff] }
 0x667   :  { %4299 = vmatprep.mubr.msk.f32.mxu1 %vm4703_vm12, %v4702_v41  ;;  %4292 = vmatpush3.msra.mxu1 %v1511_v40  ;;  %v1875_v42 = vld [vmem:[%s5707_s9 + $0x18] sm:$0xff] }
 0x668   :  { %v1173_v48 = vrot.slane %v1172_v39, 4  ;;  %4293 = vmatprep.subr.mxu1 %v4702_v41 }
 0x669   :  { %4294 = vmatpush3.msra.mxu1 %v1510_v44 }
 0x66a   :  { %v1174_v47 = vadd.f32 %v1173_v48, %v1172_v39  ;;  %4295 = vmatprep.subr.mxu1 %v4702_v41  ;;  %v1790_v39 = vld [vmem:[%s5706_s8 + $0x10] sm:$0xff] }
 0x66b   :  { %4296 = vmatpush3.msra.mxu1 %v1509_v16  ;;  %v1874_v48 = vld [vmem:[%s5707_s9 + $0x10] sm:$0xff]  ;;  %v1712_v16 = vrot.slane %v5194_v31, %v4941_v50 }
 0x66c   :  { %v1175_v11 = vrot.slane %v1174_v47, 2  ;;  %4297 = vmatprep.subr.mxu1 %v4702_v41 }
 0x66d   :  { %4298 = vmatpush3.msra.mxu1 %v1508_v45  ;;  %v1618_v45 = vrot.slane %v5194_v31, %v4835_v15 }
 0x66e   :  { %v1176_v32 = vadd.f32 %v1175_v11, %v1174_v47  ;;  %4320 = vmatprep.subr.mxu1 %v4702_v41  ;;  %v1789_v47 = vld [vmem:[%s5706_s8 + $0x8] sm:$0xff] }
 0x66f   :  { %v1873_v11 = vld [vmem:[%s5707_s9 + $0x8] sm:$0xff] }
 0x670   :  { %v1177_v34 = vrot.slane %v1176_v32, 1 }
 0x672   :  { %v1178_v36 = vadd.f32 %v1177_v34, %v1176_v32  ;;  %v1788_v32 = vld [vmem:[%s5706_s8] sm:$0xff] }
 0x673   :  { %v1872_v34 = vld [vmem:[%s5707_s9] sm:$0xff] }
 0x674   :  { %v1183_v38 = vmul.f32 0.0625, %v1178_v36  ;;  %v3924_v36 = vld [vmem:[%s5700_s2 + $0x4] sm:$0xf] }
 0x676   :  { %4289 = vmatmul.mubr.msk.f32.vlgmr.msra.gmra.mxu0 %vm1054_vm11, %v1183_v38 }
 0x677   :  { %4306 = vmatprep.mubr.msk.f32.mxu0 %vm4703_vm12, %v4702_v41  ;;  %4303 = vmatpush3.msra.mxu0 %v1626_v49 }
 0x678   :  { %4304 = vmatprep.subr.mxu0 %v4702_v41 }
 0x679   :  { %4305 = vmatpush3.msra.mxu0 %v1625_v51 }
 0x67a   :  { %4307 = vmatmul.mubr.msk.f32.vlgmr.msra.gmra.mxu0 %vm1054_vm11, %v56_v52  ;;  %4309 = vmatprep.subr.mxu0 %v4702_v41 }
 0x67b   :  { %4317 = vmatprep.mubr.msk.f32.mxu0 %vm4703_vm12, %v4702_v41  ;;  %4310 = vmatpush3.msra.mxu0 %v1708_v63  ;;  %v3944_v63 = vld [vmem:[%s5701_s3 + $0x30] sm:$0xff] }
 0x67c   :  { %4311 = vmatprep.subr.mxu0 %v4702_v41 }
 0x67d   :  { %4312 = vmatpush3.msra.mxu0 %v1707_v46  ;;  %v5312_v46 = vld [vmem:[%s5708_s10 + $0x10] sm:$0xff] }
 0x67e   :  { %4313 = vmatprep.subr.mxu0 %v4702_v41 }
 0x67f   :  { %4314 = vmatpush3.msra.mxu0 %v1706_v17 }
 0x680   :  { %4315 = vmatprep.subr.mxu0 %v4702_v41 }
 0x681   :  { %4316 = vmatpush3.msra.mxu0 %v1705_v18 }
 0x682   :  { %4331 = vmatprep.subr.mxu0 %v4702_v41 }
 0x6e9   :  { %v1261_v53 = vpop.f32.mrf.mxu0 }
 0x6eb   :  { %v4269_v54 = vpop.f32.mrf.mxu0 }
 0x71a   :  { %v1342_v55 = vpop.f32.mrf.mxu0 }
 0x71b   :  { %v1520_v0 = vrot.slane %v1342_v55, 7 }
 0x71c   :  { %v4276_v58 = vpop.f32.mrf.mxu0 }
 0x71d   :  { %v1522_v6 = vsel %vm1521_vm13, %v1520_v0, %v1261_v53  ;;  %v1623_v53 = vrot.slane %v5194_v31, %v4868_v10  ;;  %v4646_v0 = vld [vmem:[%s5699_s1 + $0x8] sm:$0xff] }
 0x71e   :  { %v3943_v31 = vld [vmem:[%s5701_s3 + $0x28] sm:$0xff] }
 0x726   :  { %v1423_v60 = vpop.f32.mrf.mxu1 }
 0x727   :  { %v1523_v4 = vrot.slane %v1423_v60, 6 }
 0x728   :  { %v4283_v62 = vpop.f32.mrf.mxu1 }
 0x729   :  { %v1525_v8 = vsel %vm1524_vm14, %v1523_v4, %v1522_v6  ;;  %v4645_v62 = vld [vmem:[%s5699_s1] sm:$0xff]  ;;  %v4647_v4 = vld [vmem:[%s5699_s1 + $0x10] sm:$0xff] }
 0x72a   :  { %v4649_v6 = vld [vmem:[%s5699_s1 + $0x20] sm:$0xff] }
 0x736   :  { %v1504_v5 = vpop.f32.mrf.mxu0 }
 0x737   :  { %v1526_v7 = vrot.slane %v1504_v5, 5  ;;  %v4648_v5 = vld [vmem:[%s5699_s1 + $0x18] sm:$0xff] }
 0x738   :  { %v4290_v9 = vpop.f32.mrf.mxu0 }
 0x739   :  { %v1528_v12 = vsel %vm1527_vm15, %v1526_v7, %v1525_v8  ;;  %v4650_v7 = vld [vmem:[%s5699_s1 + $0x28] sm:$0xff]  ;;  %v4651_v8 = vld [vmem:[%s5699_s1 + $0x30] sm:$0xff]  ;;  %v4652_v9 = vld [vmem:[%s5699_s1 + $0x38] sm:$0xff] }
 0x73a   :  { %4300 = vmatmul.mubr.msk.f32.vlgmr.msra.gmra.mxu1 %vm254_vm2, %v1528_v12  ;;  %v1700_v59 = vpop.f32.mrf.mxu0  ;;  %v3945_v12 = vld [vmem:[%s5701_s3 + $0x38] sm:$0xff] }
 0x73b   :  { %4328 = vmatprep.mubr.msk.f32.mxu1 %vm4703_vm12, %v4702_v41  ;;  %v1701_v33 = vadd.f32 %v1700_v59, %v1630_v13  ;;  %4321 = vmatpush3.msra.mxu1 %v1791_v28  ;;  %v3942_v59 = vld [vmem:[%s5701_s3 + $0x20] sm:$0xff] }
 0x73c   :  { %v4308_v29 = vpop.f32.mrf.mxu0  ;;  %4322 = vmatprep.subr.mxu1 %v4702_v41 }
 0x73d   :  { %v1704_v19 = vmax.f32 %v1701_v33, 0.0  ;;  %4323 = vmatpush3.msra.mxu1 %v1790_v39  ;;  %v1962_v29 = vrot.slane %v5312_v46, %v4835_v15 }
 0x73e   :  { %4324 = vmatprep.subr.mxu1 %v4702_v41 }
 0x73f   :  { %4318 = vmatmul.mubr.msk.f32.vlgmr.msra.gmra.mxu0 %vm254_vm2, %v1704_v19  ;;  %4325 = vmatpush3.msra.mxu1 %v1789_v47 }
 0x740   :  { %4339 = vmatprep.mubr.msk.f32.mxu0 %vm4703_vm12, %v4702_v41  ;;  %4332 = vmatpush3.msra.mxu0 %v1875_v42 }
 0x741   :  { %4333 = vmatprep.subr.mxu0 %v4702_v41  ;;  %4326 = vmatprep.subr.mxu1 %v4702_v41 }
 0x742   :  { %4334 = vmatpush3.msra.mxu0 %v1874_v48  ;;  %4327 = vmatpush3.msra.mxu1 %v1788_v32 }
 0x743   :  { %4335 = vmatprep.subr.mxu0 %v4702_v41  ;;  %4342 = vmatprep.subr.msk.mxu1 %vm89_vm0, %v3924_v36 }
 0x744   :  { %4336 = vmatpush3.msra.mxu0 %v1873_v11 }
 0x745   :  { %4337 = vmatprep.subr.mxu0 %v4702_v41 }
 0x746   :  { %4338 = vmatpush3.msra.mxu0 %v1872_v34 }
 0x747   :  { %4356 = vmatprep.subr.mxu0 %v3945_v12 }
 0x7fa   :  { %v1597_v21 = vpop.f32.mrf.mxu1 }
 0x7fb   :  { %v1598_v56 = vadd.f32 %v1597_v21, %v1515_v61 }
 0x7fc   :  { %v4301_v22 = vpop.f32.mrf.mxu1 }
 0x7fd   :  { %v1602_v24 = vsel %vm1601_vm3, %v1598_v56, 0.0 }
 0x7fe   :  { %1603 = vadd.xlane.f32.xlu0 %v1602_v24 }
 0x7ff   :  { %v1782_v2 = vpop.f32.mrf.mxu0 }
 0x800   :  { %v1783_v49 = vadd.f32 %v1782_v2, %v1712_v16 }
 0x801   :  { %v4319_v30 = vpop.f32.mrf.mxu0 }
 0x802   :  { %v1786_v55 = vmax.f32 %v1783_v49, 0.0 }
 0x887   :  { %v1604_v25 = vpop.xlane.xlu0 %1603 }
 0x888   :  { %v1605_v35 = vmul.f32 0.03125, %v1604_v25 }
 0x88a   :  { %v1606_v26 = vsub.f32 %v1598_v56, %v1605_v35 }
 0x88c   :  { %v1607_v27 = vmul.f32 %v1606_v26, %v1606_v26 }
 0x88e   :  { %v1608_v37 = vsel %vm1601_vm3, %v1607_v27, 0.0 }
 0x88f   :  { %1609 = vadd.xlane.f32.xlu1 %v1608_v37 }
 0x918   :  { %v1610_v38 = vpop.xlane.xlu1 %1609 }
 0x919   :  { %v1611_v40 = vmul.f32 0.03125, %v1610_v38 }
 0x91b   :  { %v1612_v44 = vadd.f32 1e-05, %v1611_v40 }
 0x91d   :  { %4576 = vrsqrt.f32 %v1612_v44 }
 0x92a   :  { %v4577_v51 = vpop.eup %4576 }
 0x92b   :  { %v1614_v52 = vmul.f32 %v4577_v51, %v1606_v26 }
 0x92d   :  { %v1619_v54 = vmul.f32 %v1618_v45, %v1614_v52 }
 0x92f   :  { %v1624_v58 = vadd.f32 %v1623_v53, %v1619_v54 }
 0x931   :  { %v1787_v60 = vadd.f32 %v1786_v55, %v1624_v58 }
 0x933   :  { %4329 = vmatmul.mubr.msk.f32.vlgmr.msra.gmra.mxu1 %vm254_vm2, %v1787_v60  ;;  %4340 = vmatmul.mubr.msk.f32.vlgmr.msra.gmra.mxu0 %vm254_vm2, %v1787_v60 }
 0x934   :  { %4343 = vmatpush3.msk.msra.mxu1 %vm89_vm0, %v3924_v36  ;;  %4344 = vmatprep.mubr.msk.f32.mxu1 %vm64_vm1, %v4645_v62 }
 0x935   :  { %4357 = vmatpush3.msra.mxu0 %v3945_v12 }
 0x936   :  { %4358 = vmatprep.subr.mxu0 %v3944_v63 }
 0x937   :  { %4345 = vmatmul.mubr.msk.f32.vlgmr.msra.gmra.mxu1 %vm64_vm1, %v4646_v0  ;;  %4359 = vmatpush3.msra.mxu0 %v3944_v63 }
 0x938   :  { %4347 = vmatprep.mubr.msk.f32.mxu1 %vm64_vm1, %v4647_v4  ;;  %4360 = vmatprep.subr.mxu0 %v3943_v31 }
 0x939   :  { %4361 = vmatpush3.msra.mxu0 %v3943_v31 }
 0x93a   :  { %4362 = vmatprep.subr.mxu0 %v3942_v59 }
 0x93b   :  { %4348 = vmatmul.mubr.msk.f32.gmra.mxu1 %vm64_vm1, %v4648_v5  ;;  %4363 = vmatpush3.msra.mxu0 %v3942_v59 }
 0x93c   :  { %4350 = vmatprep.mubr.msk.f32.mxu1 %vm64_vm1, %v4649_v6 }
 0x93f   :  { %4351 = vmatmul.mubr.msk.f32.gmra.mxu1 %vm64_vm1, %v4650_v7 }
 0x940   :  { %4353 = vmatprep.mubr.msk.f32.mxu1 %vm64_vm1, %v4651_v8 }
 0x943   :  { %4354 = vmatmul.mubr.msk.f32.gmra.mxu1 %vm64_vm1, %v4652_v9 }
 0x9f3   :  { %v5314_v13 = vpop.f32.mrf.mxu1  ;;  %v5316_v17 = vpop.f32.mrf.mxu0 }
 0x9f5   :  { %v4330_v33 = vpop.f32.mrf.mxu1  ;;  %v4341_v18 = vpop.f32.mrf.mxu0 }
 0x9f7   :  { %v4346_v19 = vpop.f32.mrf.mxu1 }
 0x9f8   :  { %v2038_v20 = vadd.f32 %v4346_v19, %v1962_v29 }
 0x9f9   :  { %v2032_v61 = vpop.f32.mrf.mxu1 }
 0x9fa   :  { %v2080_v21 = vmin.f32 %v2038_v20, 0.0  ;;  %v2033_v56 = vadd.f32 %v2032_v61, %v1962_v29  ;;  %vm2072_vm1 = vcmp.gt.f32.partialorder %v2038_v20, 0.0 }
 0x9fb   :  { %v4349_v22 = vpop.f32.mrf.mxu1 }
 0x9fc   :  { %v2089_v24 = vmul.f32 1.442695, %v2080_v21  ;;  %v2079_v25 = vmin.f32 %v2033_v56, 0.0  ;;  %v2048_v35 = vadd.f32 %v4349_v22, %v1962_v29  ;;  %vm2071_vm0 = vcmp.gt.f32.partialorder %v2033_v56, 0.0 }
 0x9fd   :  { %v2042_v26 = vpop.f32.mrf.mxu1 }
 0x9fe   :  { %4578 = vpow2.f32 %v2089_v24  ;;  %v2087_v27 = vmul.f32 1.442695, %v2079_v25  ;;  %v2082_v37 = vmin.f32 %v2048_v35, 0.0  ;;  %v2043_v2 = vadd.f32 %v2042_v26, %v1962_v29 }
 0x9ff   :  { %v4352_v28 = vpop.f32.mrf.mxu1  ;;  %vm2074_vm5 = vcmp.gt.f32.partialorder %v2048_v35, 0.0  ;;  %v2127_v24 = vrot.slane %v5312_v46, %v4868_v10 }
 0xa00   :  { %4580 = vpow2.f32 %v2087_v27  ;;  %v2093_v42 = vmul.f32 1.442695, %v2082_v37  ;;  %v2058_v30 = vadd.f32 %v4352_v28, %v1962_v29  ;;  %v2081_v39 = vmin.f32 %v2043_v2, 0.0 }
 0xa01   :  { %v2052_v48 = vpop.f32.mrf.mxu1  ;;  %vm2073_vm4 = vcmp.gt.f32.partialorder %v2043_v2, 0.0 }
 0xa02   :  { %4582 = vpow2.f32 %v2093_v42  ;;  %v2084_v47 = vmin.f32 %v2058_v30, 0.0  ;;  %v2053_v11 = vadd.f32 %v2052_v48, %v1962_v29  ;;  %v2091_v32 = vmul.f32 1.442695, %v2081_v39 }
 0xa03   :  { %v4355_v34 = vpop.f32.mrf.mxu1  ;;  %vm2076_vm7 = vcmp.gt.f32.partialorder %v2058_v30, 0.0 }
 0xa04   :  { %v2097_v36 = vmul.f32 1.442695, %v2084_v47  ;;  %v2083_v38 = vmin.f32 %v2053_v11, 0.0  ;;  %v2068_v40 = vadd.f32 %v4355_v34, %v1962_v29  ;;  %4584 = vpow2.f32 %v2091_v32 }
 0xa05   :  { %v2062_v44 = vpop.f32.mrf.mxu1  ;;  %vm2075_vm6 = vcmp.gt.f32.partialorder %v2053_v11, 0.0 }
 0xa06   :  { %4586 = vpow2.f32 %v2097_v36  ;;  %v2095_v16 = vmul.f32 1.442695, %v2083_v38  ;;  %v2086_v45 = vmin.f32 %v2068_v40, 0.0  ;;  %v2063_v49 = vadd.f32 %v2062_v44, %v1962_v29 }
 0xa07   :  { %vm2078_vm9 = vcmp.gt.f32.partialorder %v2068_v40, 0.0 }
 0xa08   :  { %4588 = vpow2.f32 %v2095_v16  ;;  %v2101_v51 = vmul.f32 1.442695, %v2086_v45  ;;  %v2085_v52 = vmin.f32 %v2063_v49, 0.0  ;;  %vm2077_vm8 = vcmp.gt.f32.partialorder %v2063_v49, 0.0 }
 0xa0a   :  { %4590 = vpow2.f32 %v2101_v51  ;;  %v2099_v54 = vmul.f32 1.442695, %v2085_v52 }
 0xa0b   :  { %v4579_v53 = vpop.eup %4578 }
 0xa0c   :  { %v3935_v58 = vadd.f32 -1.0, %v4579_v53  ;;  %4592 = vpow2.f32 %v2099_v54 }
 0xa0d   :  { %v4581_v55 = vpop.eup %4580 }
 0xa0e   :  { %v3934_v60 = vadd.f32 -1.0, %v4581_v55  ;;  %v2112_v4 = vsel %vm2072_vm1, %v2038_v20, %v3935_v58 }
 0xa0f   :  { %v4583_v62 = vpop.eup %4582 }
 0xa10   :  { %v2111_v0 = vsel %vm2071_vm0, %v2033_v56, %v3934_v60  ;;  %v3937_v6 = vadd.f32 -1.0, %v4583_v62 }
 0xa11   :  { %4364 = vmatprep.mubr.msk.f32.mxu0 %vm254_vm2, %v2111_v0  ;;  %v4585_v5 = vpop.eup %4584 }
 0xa12   :  { %4365 = vmatmul.mubr.msk.f32.vlgmr.msra.gmra.mxu0 %vm254_vm2, %v2112_v4  ;;  %v3936_v8 = vadd.f32 -1.0, %v4585_v5  ;;  %v2114_v63 = vsel %vm2074_vm5, %v2048_v35, %v3937_v6 }
 0xa13   :  { %v4587_v7 = vpop.eup %4586 }
 0xa14   :  { %v2113_v12 = vsel %vm2073_vm4, %v2043_v2, %v3936_v8  ;;  %v3939_v59 = vadd.f32 -1.0, %v4587_v7 }
 0xa15   :  { %v4589_v9 = vpop.eup %4588  ;;  %4367 = vmatprep.mubr.msk.f32.mxu0 %vm254_vm2, %v2113_v12 }
 0xa16   :  { %v3938_v31 = vadd.f32 -1.0, %v4589_v9  ;;  %4368 = vmatmul.mubr.msk.f32.gmra.mxu0 %vm254_vm2, %v2114_v63  ;;  %v2116_v19 = vsel %vm2076_vm7, %v2058_v30, %v3939_v59 }
 0xa17   :  { %v4591_v29 = vpop.eup %4590 }
 0xa18   :  { %v2115_v33 = vsel %vm2075_vm6, %v2053_v11, %v3938_v31  ;;  %v3941_v20 = vadd.f32 -1.0, %v4591_v29 }
 0xa19   :  { %4370 = vmatprep.mubr.msk.f32.mxu0 %vm254_vm2, %v2115_v33  ;;  %v4593_v18 = vpop.eup %4592 }
 0xa1a   :  { %4371 = vmatmul.mubr.msk.f32.gmra.mxu0 %vm254_vm2, %v2116_v19  ;;  %v3940_v61 = vadd.f32 -1.0, %v4593_v18  ;;  %v2118_v56 = vsel %vm2078_vm9, %v2068_v40, %v3941_v20 }
 0xa1c   :  { %v2117_v21 = vsel %vm2077_vm8, %v2063_v49, %v3940_v61 }
 0xa1d   :  { %4373 = vmatprep.mubr.msk.f32.mxu0 %vm254_vm2, %v2117_v21 }
 0xa1e   :  { %4374 = vmatmul.mubr.msk.f32.gmra.mxu0 %vm254_vm2, %v2118_v56 }
 0xad2   :  { %v4366_v22 = vpop.f32.mrf.mxu0 }
 0xad3   :  { %v2224_v26 = vadd.f32 %v4366_v22, %v2127_v24 }
 0xad4   :  { %v2218_v25 = vpop.f32.mrf.mxu0 }
 0xad5   :  { %v2219_v35 = vadd.f32 %v2218_v25, %v2127_v24  ;;  %v2260_v39 = vsel %vm254_vm2, %v2224_v26, 0.0 }
 0xad6   :  { %v4369_v27 = vpop.f32.mrf.mxu0 }
 0xad7   :  { %v2257_v37 = vsel %vm254_vm2, %v2219_v35, 0.0  ;;  %v2234_v42 = vadd.f32 %v4369_v27, %v2127_v24 }
 0xad8   :  { %2258 = vadd.xlane.f32.xlu0 %v2257_v37  ;;  %v2228_v2 = vpop.f32.mrf.mxu0 }
 0xad9   :  { %v2229_v28 = vadd.f32 %v2228_v2, %v2127_v24  ;;  %v2266_v36 = vsel %vm254_vm2, %v2234_v42, 0.0 }
 0xada   :  { %v4372_v30 = vpop.f32.mrf.mxu0 }
 0xadb   :  { %v2263_v48 = vsel %vm254_vm2, %v2229_v28, 0.0  ;;  %v2244_v32 = vadd.f32 %v4372_v30, %v2127_v24 }
 0xadc   :  { %2261 = vadd.xlane.f32.xlu0 %v2260_v39  ;;  %v2238_v47 = vpop.f32.mrf.mxu0  ;;  %2264 = vadd.xlane.f32.xlu1 %v2263_v48 }
 0xadd   :  { %v2239_v11 = vadd.f32 %v2238_v47, %v2127_v24  ;;  %v2272_v45 = vsel %vm254_vm2, %v2244_v32, 0.0 }
 0xade   :  { %v4375_v34 = vpop.f32.mrf.mxu0 }
 0xadf   :  { %v2269_v38 = vsel %vm254_vm2, %v2239_v11, 0.0  ;;  %v2254_v16 = vadd.f32 %v4375_v34, %v2127_v24  ;;  %v3955_v34 = vld [vmem:[%s5702_s4 + $0x28] sm:$0xff] }
 0xae0   :  { %2267 = vadd.xlane.f32.xlu0 %v2266_v36  ;;  %v2248_v40 = vpop.f32.mrf.mxu0  ;;  %2270 = vadd.xlane.f32.xlu1 %v2269_v38  ;;  %v3954_v36 = vld [vmem:[%s5702_s4 + $0x20] sm:$0xff]  ;;  %v2534_v38 = vrot.slane %v5312_v46, %v660_v23 }
 0xae1   :  { %v2249_v44 = vadd.f32 %v2248_v40, %v2127_v24  ;;  %v2278_v51 = vsel %vm254_vm2, %v2254_v16, 0.0 }
 0xae3   :  { %v2275_v49 = vsel %vm254_vm2, %v2249_v44, 0.0 }
 0xae4   :  { %2273 = vadd.xlane.f32.xlu0 %v2272_v45  ;;  %2276 = vadd.xlane.f32.xlu1 %v2275_v49 }
 0xae8   :  { %2279 = vadd.xlane.f32.xlu0 %v2278_v51 }
 0xb61   :  { %v2259_v52 = vpop.xlane.xlu0 %2258 }
 0xb62   :  { %v2281_v53 = vmul.f32 0.03125, %v2259_v52 }
 0xb64   :  { %v5338_v54 = vsub.f32 %v2219_v35, %v2281_v53 }
 0xb65   :  { %v2262_v55 = vpop.xlane.xlu0 %2261  ;;  %v2265_v58 = vpop.xlane.xlu1 %2264 }
 0xb66   :  { %v2282_v60 = vmul.f32 0.03125, %v2262_v55  ;;  %v2297_v62 = vmul.f32 %v5338_v54, %v5338_v54  ;;  %v2283_v0 = vmul.f32 0.03125, %v2265_v58 }
 0xb68   :  { %v5342_v4 = vsub.f32 %v2224_v26, %v2282_v60  ;;  %v2305_v5 = vsel %vm254_vm2, %v2297_v62, 0.0  ;;  %v5345_v6 = vsub.f32 %v2229_v28, %v2283_v0 }
 0xb69   :  { %2306 = vadd.xlane.f32.xlu1 %v2305_v5  ;;  %v2268_v7 = vpop.xlane.xlu0 %2267  ;;  %v2271_v8 = vpop.xlane.xlu1 %2270 }
 0xb6a   :  { %v2284_v9 = vmul.f32 0.03125, %v2268_v7  ;;  %v2298_v12 = vmul.f32 %v5342_v4, %v5342_v4  ;;  %v2285_v63 = vmul.f32 0.03125, %v2271_v8  ;;  %v2299_v31 = vmul.f32 %v5345_v6, %v5345_v6 }
 0xb6c   :  { %v5351_v59 = vsub.f32 %v2234_v42, %v2284_v9  ;;  %v2308_v29 = vsel %vm254_vm2, %v2298_v12, 0.0  ;;  %v5354_v33 = vsub.f32 %v2239_v11, %v2285_v63  ;;  %v2311_v18 = vsel %vm254_vm2, %v2299_v31, 0.0  ;;  %v3957_v11 = vld [vmem:[%s5702_s4 + $0x38] sm:$0xff] }
 0xb6d   :  { %2309 = vadd.xlane.f32.xlu0 %v2308_v29  ;;  %v2274_v19 = vpop.xlane.xlu0 %2273  ;;  %v2277_v20 = vpop.xlane.xlu1 %2276  ;;  %2312 = vadd.xlane.f32.xlu1 %v2311_v18  ;;  %v2364_v18 = vrot.slane %v5312_v46, %v4938_v43 }
 0xb6e   :  { %v2286_v61 = vmul.f32 0.03125, %v2274_v19  ;;  %v2300_v21 = vmul.f32 %v5351_v59, %v5351_v59  ;;  %v2287_v56 = vmul.f32 0.03125, %v2277_v20  ;;  %v2301_v22 = vmul.f32 %v5354_v33, %v5354_v33  ;;  %4376 = vmatprep.subr.mxu1 %v3957_v11 }
 0xb6f   :  { %4377 = vmatpush3.msra.mxu1 %v3957_v11 }
 0xb70   :  { %v5361_v24 = vsub.f32 %v2244_v32, %v2286_v61  ;;  %v2314_v25 = vsel %vm254_vm2, %v2300_v21, 0.0  ;;  %v5364_v35 = vsub.f32 %v2249_v44, %v2287_v56  ;;  %v2317_v26 = vsel %vm254_vm2, %v2301_v22, 0.0  ;;  %v3956_v32 = vld [vmem:[%s5702_s4 + $0x30] sm:$0xff]  ;;  %s4704_s4 = smov [#allocation2]  }
 0xb71   :  { %2315 = vadd.xlane.f32.xlu0 %v2314_v25  ;;  %v2280_v27 = vpop.xlane.xlu0 %2279  ;;  %2318 = vadd.xlane.f32.xlu1 %v2317_v26  ;;  %v2376_v56 = vrot.slane %v5312_v46, %v4941_v50 }
 0xb72   :  { %v2288_v37 = vmul.f32 0.03125, %v2280_v27  ;;  %v2302_v2 = vmul.f32 %v5361_v24, %v5361_v24  ;;  %v2303_v28 = vmul.f32 %v5364_v35, %v5364_v35  ;;  %4378 = vmatprep.subr.mxu1 %v3956_v32 }
 0xb73   :  { %4379 = vmatpush3.msra.mxu1 %v3956_v32 }
 0xb74   :  { %v5371_v42 = vsub.f32 %v2254_v16, %v2288_v37  ;;  %v2320_v30 = vsel %vm254_vm2, %v2302_v2, 0.0  ;;  %v2323_v39 = vsel %vm254_vm2, %v2303_v28, 0.0  ;;  %4380 = vmatprep.subr.mxu1 %v3955_v34 }
 0xb75   :  { %2321 = vadd.xlane.f32.xlu0 %v2320_v30  ;;  %2324 = vadd.xlane.f32.xlu1 %v2323_v39 }
 0xb76   :  { %v2304_v48 = vmul.f32 %v5371_v42, %v5371_v42  ;;  %4381 = vmatpush3.msra.mxu1 %v3955_v34 }
 0xb77   :  { %4382 = vmatprep.subr.mxu1 %v3954_v36 }
 0xb78   :  { %v2326_v47 = vsel %vm254_vm2, %v2304_v48, 0.0  ;;  %4383 = vmatpush3.msra.mxu1 %v3954_v36 }
 0xb79   :  { %2327 = vadd.xlane.f32.xlu0 %v2326_v47 }
 0xb86   :  { %2536 = vrot.lane.b32.xlu1 %v2534_v38, %s4699_s17  ;;  %s3840_s17 = sshll.u32 %s4704_s4, 4  ;;  %s3841_s17 = int_to_ptr.vmem [resolvable:$true] %s3840_s17 }
 0xb87   :  { %p4660_p1 = scmp.lt.s32.totalorder %s3841_s17, %s3841_s17 }
 0xbf2   :  { %v2307_v40 = vpop.xlane.xlu1 %2306 }
 0xbf3   :  { %v2329_v44 = vmul.f32 0.03125, %v2307_v40 }
 0xbf5   :  { %v2337_v16 = vadd.f32 1e-05, %v2329_v44 }
 0xbf6   :  { %v2310_v45 = vpop.xlane.xlu0 %2309  ;;  %v2313_v49 = vpop.xlane.xlu1 %2312 }
 0xbf7   :  { %4594 = vrsqrt.f32 %v2337_v16  ;;  %v2330_v51 = vmul.f32 0.03125, %v2310_v45  ;;  %v2331_v52 = vmul.f32 0.03125, %v2313_v49 }
 0xbf9   :  { %v2338_v53 = vadd.f32 1e-05, %v2330_v51  ;;  %v2339_v55 = vadd.f32 1e-05, %v2331_v52 }
 0xbfa   :  { %v2316_v58 = vpop.xlane.xlu0 %2315  ;;  %v2319_v60 = vpop.xlane.xlu1 %2318 }
 0xbfb   :  { %4596 = vrsqrt.f32 %v2338_v53  ;;  %v2332_v62 = vmul.f32 0.03125, %v2316_v58  ;;  %v2333_v0 = vmul.f32 0.03125, %v2319_v60  ;;  %v2522_v58 = vrot.slane %v5312_v46, %v648_v3 }
 0xbfc   :  { %4598 = vrsqrt.f32 %v2339_v55 }
 0xbfd   :  { %v2340_v5 = vadd.f32 1e-05, %v2332_v62  ;;  %v2341_v23 = vadd.f32 1e-05, %v2333_v0 }
 0xbfe   :  { %v2322_v7 = vpop.xlane.xlu0 %2321  ;;  %v2325_v8 = vpop.xlane.xlu1 %2324 }
 0xbff   :  { %4600 = vrsqrt.f32 %v2340_v5  ;;  %v2334_v9 = vmul.f32 0.03125, %v2322_v7  ;;  %v2335_v12 = vmul.f32 0.03125, %v2325_v8 }
 0xc00   :  { %4602 = vrsqrt.f32 %v2341_v23 }
 0xc01   :  { %v2342_v63 = vadd.f32 1e-05, %v2334_v9  ;;  %v2343_v31 = vadd.f32 1e-05, %v2335_v12 }
 0xc02   :  { %v2328_v29 = vpop.xlane.xlu0 %2327 }
 0xc03   :  { %4604 = vrsqrt.f32 %v2342_v63  ;;  %v2336_v19 = vmul.f32 0.03125, %v2328_v29 }
 0xc04   :  { %v4595_v20 = vpop.eup %4594  ;;  %4606 = vrsqrt.f32 %v2343_v31 }
 0xc05   :  { %v2344_v61 = vadd.f32 1e-05, %v2336_v19  ;;  %v2353_v21 = vmul.f32 %v4595_v20, %v5338_v54 }
 0xc07   :  { %4608 = vrsqrt.f32 %v2344_v61  ;;  %v2365_v22 = vmul.f32 %v2364_v18, %v2353_v21 }
 0xc08   :  { %v4597_v25 = vpop.eup %4596 }
 0xc09   :  { %v4599_v26 = vpop.eup %4598  ;;  %v2354_v27 = vmul.f32 %v4597_v25, %v5342_v4  ;;  %v2377_v37 = vadd.f32 %v2376_v56, %v2365_v22 }
 0xc0a   :  { %v2355_v2 = vmul.f32 %v4599_v26, %v5345_v6 }
 0xc0b   :  { %v2366_v28 = vmul.f32 %v2364_v18, %v2354_v27  ;;  %4384 = vmatprep.mubr.msk.f32.mxu1 %vm254_vm2, %v2377_v37 }
 0xc0c   :  { %v4601_v30 = vpop.eup %4600  ;;  %v2367_v39 = vmul.f32 %v2364_v18, %v2355_v2 }
 0xc0d   :  { %v4603_v48 = vpop.eup %4602  ;;  %v2378_v47 = vadd.f32 %v2376_v56, %v2366_v28  ;;  %v2356_v54 = vmul.f32 %v4601_v30, %v5351_v59 }
 0xc0e   :  { %v2379_v11 = vadd.f32 %v2376_v56, %v2367_v39  ;;  %v2357_v32 = vmul.f32 %v4603_v48, %v5354_v33 }
 0xc0f   :  { %4385 = vmatmul.mubr.msk.f32.vlgmr.msra.gmra.mxu1 %vm254_vm2, %v2378_v47  ;;  %v2368_v34 = vmul.f32 %v2364_v18, %v2356_v54 }
 0xc10   :  { %v4605_v36 = vpop.eup %4604  ;;  %4387 = vmatprep.mubr.msk.f32.mxu1 %vm254_vm2, %v2379_v11  ;;  %v2369_v4 = vmul.f32 %v2364_v18, %v2357_v32 }
 0xc11   :  { %v4607_v6 = vpop.eup %4606  ;;  %v2380_v38 = vadd.f32 %v2376_v56, %v2368_v34  ;;  %v2358_v40 = vmul.f32 %v4605_v36, %v5361_v24 }
 0xc12   :  { %v2381_v44 = vadd.f32 %v2376_v56, %v2369_v4  ;;  %v2359_v16 = vmul.f32 %v4607_v6, %v5364_v35  ;;  %v2537_v35 = vpop.permute.xlu1 %2536 }
 0xc13   :  { %4388 = vmatmul.mubr.msk.f32.gmra.mxu1 %vm254_vm2, %v2380_v38  ;;  %v2370_v59 = vmul.f32 %v2364_v18, %v2358_v40 }
 0xc14   :  { %v4609_v45 = vpop.eup %4608  ;;  %4390 = vmatprep.mubr.msk.f32.mxu1 %vm254_vm2, %v2381_v44  ;;  %v2371_v33 = vmul.f32 %v2364_v18, %v2359_v16 }
 0xc15   :  { %v2382_v49 = vadd.f32 %v2376_v56, %v2370_v59  ;;  %v2360_v51 = vmul.f32 %v4609_v45, %v5371_v42 }
 0xc16   :  { %v2383_v52 = vadd.f32 %v2376_v56, %v2371_v33 }
 0xc17   :  { %4391 = vmatmul.mubr.msk.f32.gmra.mxu1 %vm254_vm2, %v2382_v49  ;;  %v2372_v53 = vmul.f32 %v2364_v18, %v2360_v51 }
 0xc18   :  { %4393 = vmatprep.mubr.msk.f32.mxu1 %vm254_vm2, %v2383_v52  ;;  %v2550_v52 = vrot.slane %v5312_v46, %v676_v57 }
 0xc19   :  { %v2384_v24 = vadd.f32 %v2376_v56, %v2372_v53 }
 0xc1b   :  { %4394 = vmatmul.mubr.msk.f32.gmra.mxu1 %vm254_vm2, %v2384_v24 }
 0xccf   :  { %v5414_v55 = vpop.f32.mrf.mxu1 }
 0xcd0   :  { %v2540_v60 = vadd.f32 %v5414_v55, %v2537_v35  ;;  %v2524_v25 = vadd.f32 %v5414_v55, %v2522_v58 }
 0xcd1   :  { %v5420_v62 = vpop.f32.mrf.mxu1 }
 0xcd2   :  { %v2523_v42 = vadd.f32 %v2522_v58, %v5420_v62  ;;  %2567 = vrot.lane.b32.xlu0 %v2540_v60, %s4700_s18  ;;  %v2539_v9 = vadd.f32 %v2537_v35, %v5420_v62 }
 0xcd3   :  { %v5424_v0 = vpop.f32.mrf.mxu1 }
 0xcd4   :  { %v2542_v5 = vadd.f32 %v5424_v0, %v2537_v35  ;;  %4400 = vmatprep.mubr.msk.f32.mxu0 %vm254_vm2, %v2523_v42  ;;  %v2526_v26 = vadd.f32 %v5424_v0, %v2522_v58 }
 0xcd5   :  { %v5428_v23 = vpop.f32.mrf.mxu1 }
 0xcd6   :  { %v2525_v7 = vadd.f32 %v2522_v58, %v5428_v23  ;;  %v2541_v3 = vadd.f32 %v2537_v35, %v5428_v23  ;;  %2658 = vrot.lane.b32.xlu1 %v2542_v5, %s4700_s18 }
 0xcd7   :  { %v5433_v8 = vpop.f32.mrf.mxu1 }
 0xcd8   :  { %2656 = vrot.lane.b32.xlu0 %v2541_v3, %s4700_s18  ;;  %4407 = vmatprep.mubr.msk.f32.mxu1 %vm254_vm2, %v2525_v7  ;;  %v2544_v31 = vadd.f32 %v5433_v8, %v2537_v35  ;;  %v2528_v48 = vadd.f32 %v5433_v8, %v2522_v58 }
 0xcd9   :  { %v5438_v12 = vpop.f32.mrf.mxu1 }
 0xcda   :  { %2565 = vrot.lane.b32.xlu1 %v2539_v9, %s4700_s18  ;;  %v2543_v19 = vadd.f32 %v2537_v35, %v5438_v12  ;;  %v2527_v2 = vadd.f32 %v2522_v58, %v5438_v12 }
 0xcdb   :  { %v5441_v63 = vpop.f32.mrf.mxu1 }
 0xcdc   :  { %v2546_v29 = vadd.f32 %v5441_v63, %v2537_v35  ;;  %v2530_v47 = vadd.f32 %v5441_v63, %v2522_v58 }
 0xcdd   :  { %v5445_v18 = vpop.f32.mrf.mxu1 }
 0xcde   :  { %2749 = vrot.lane.b32.xlu1 %v2544_v31, %s4700_s18  ;;  %2840 = vrot.lane.b32.xlu0 %v2546_v29, %s4700_s18  ;;  %v2545_v20 = vadd.f32 %v2537_v35, %v5445_v18  ;;  %v2529_v28 = vadd.f32 %v2522_v58, %v5445_v18 }
 0xce2   :  { %2747 = vrot.lane.b32.xlu1 %v2543_v19, %s4700_s18  ;;  %2838 = vrot.lane.b32.xlu0 %v2545_v20, %s4700_s18  ;;  %s4705_s18 = smov [#allocation4]  }
 0xd44   :  { %v2568_v61 = vpop.permute.xlu0 %2567 }
 0xd45   :  { %4396 = vmatprep.subr.msk.mxu0 %vm254_vm2, %v2568_v61 }
 0xd46   :  { %4397 = vmatpush3.xpose.msk.msra.mxu0 %vm254_vm2, %v2568_v61 }
 0xd48   :  { %v2659_v21 = vpop.permute.xlu1 %2658 }
 0xd49   :  { %4403 = vmatprep.subr.msk.mxu1 %vm254_vm2, %v2659_v21 }
 0xd4a   :  { %4404 = vmatpush3.xpose.msk.msra.mxu1 %vm254_vm2, %v2659_v21  ;;  %v2657_v56 = vpop.permute.xlu0 %2656 }
 0xd4b   :  { %4405 = vmatprep.subr.msk.mxu1 %vm254_vm2, %v2657_v56 }
 0xd4c   :  { %v2566_v22 = vpop.permute.xlu1 %2565 }
 0xd4d   :  { %4398 = vmatprep.subr.msk.mxu0 %vm254_vm2, %v2566_v22 }
 0xd4e   :  { %4399 = vmatpush3.xpose.msk.msra.mxu0 %vm254_vm2, %v2566_v22  ;;  %4406 = vmatpush3.xpose.msk.msra.mxu1 %vm254_vm2, %v2657_v56 }
 0xd50   :  { %v2750_v27 = vpop.permute.xlu1 %2749  ;;  %v2841_v37 = vpop.permute.xlu0 %2840 }
 0xd51   :  { %4401 = vmatmul.mubr.msk.f32.vlgmr.msra.gmra.mxu0 %vm254_vm2, %v2524_v25  ;;  %4408 = vmatmul.mubr.msk.f32.vlgmr.msra.gmra.mxu1 %vm254_vm2, %v2526_v26 }
 0xd52   :  { %4410 = vmatprep.subr.msk.mxu0 %vm254_vm2, %v2750_v27  ;;  %4417 = vmatprep.subr.msk.mxu1 %vm254_vm2, %v2841_v37 }
 0xd53   :  { %4411 = vmatpush3.xpose.msk.msra.mxu0 %vm254_vm2, %v2750_v27  ;;  %4414 = vmatprep.mubr.msk.f32.mxu0 %vm254_vm2, %v2527_v2 }
 0xd54   :  { %4418 = vmatpush3.xpose.msk.msra.mxu1 %vm254_vm2, %v2841_v37  ;;  %4421 = vmatprep.mubr.msk.f32.mxu1 %vm254_vm2, %v2529_v28  ;;  %v2748_v30 = vpop.permute.xlu1 %2747  ;;  %v2839_v39 = vpop.permute.xlu0 %2838 }
 0xd55   :  { %4412 = vmatprep.subr.msk.mxu0 %vm254_vm2, %v2748_v30  ;;  %4419 = vmatprep.subr.msk.mxu1 %vm254_vm2, %v2839_v39 }
 0xd57   :  { %4413 = vmatpush3.xpose.msk.msra.mxu0 %vm254_vm2, %v2748_v30 }
 0xd58   :  { %4420 = vmatpush3.xpose.msk.msra.mxu1 %vm254_vm2, %v2839_v39  ;;  %4424 = vmatprep.subr.mxu0 %v4702_v41 }
 0xd59   :  { %4438 = vmatprep.subr.mxu1 %v4702_v41 }
 0xd5a   :  { %4415 = vmatmul.mubr.msk.f32.vlgmr.msra.gmra.mxu0 %vm254_vm2, %v2528_v48 }
 0xd5b   :  { %4422 = vmatmul.mubr.msk.f32.vlgmr.msra.gmra.mxu1 %vm254_vm2, %v2530_v47  ;;  %4428 = vmatprep.mubr.msk.f32.mxu0 %vm4703_vm12, %v4702_v41 }
 0xd5c   :  { %4442 = vmatprep.mubr.msk.f32.mxu1 %vm4703_vm12, %v4702_v41 }
 0xe11   :  { %v4402_v54 = vpop.f32.mrf.mxu0  ;;  %v4409_v11 = vpop.f32.mrf.mxu1 }
 0xe12   :  { %v2930_v32 = vsel %vm1054_vm11, %v4402_v54, -inf  ;;  %v2936_v38 = vsel %vm1054_vm11, %v4409_v11, -inf }
 0xe13   :  { %2931 = vmax.xlane.f32.xlu0 %v2930_v32  ;;  %v2645_v34 = vpop.f32.mrf.mxu0  ;;  %v2736_v36 = vpop.f32.mrf.mxu1 }
 0xe14   :  { %v2927_v4 = vsel %vm1054_vm11, %v2645_v34, -inf  ;;  %v2933_v6 = vsel %vm1054_vm11, %v2736_v36, -inf }
 0xe15   :  { %2928 = vmax.xlane.f32.xlu1 %v2927_v4 }
 0xe17   :  { %2934 = vmax.xlane.f32.xlu0 %v2933_v6 }
 0xe19   :  { %2937 = vmax.xlane.f32.xlu1 %v2936_v38 }
 0xe1a   :  { %v4416_v40 = vpop.f32.mrf.mxu0 }
 0xe1b   :  { %v4423_v44 = vpop.f32.mrf.mxu1  ;;  %v2942_v59 = vsel %vm1054_vm11, %v4416_v40, -inf }
 0xe1c   :  { %v2827_v16 = vpop.f32.mrf.mxu0  ;;  %v2948_v49 = vsel %vm1054_vm11, %v4423_v44, -inf }
 0xe1d   :  { %2943 = vmax.xlane.f32.xlu1 %v2942_v59  ;;  %v2939_v45 = vsel %vm1054_vm11, %v2827_v16, -inf  ;;  %v2918_v33 = vpop.f32.mrf.mxu1 }
 0xe1e   :  { %2940 = vmax.xlane.f32.xlu0 %v2939_v45  ;;  %v2945_v51 = vsel %vm1054_vm11, %v2918_v33, -inf }
 0xe21   :  { %2949 = vmax.xlane.f32.xlu1 %v2948_v49 }
 0xe22   :  { %2946 = vmax.xlane.f32.xlu0 %v2945_v51 }
 0xe38   :  { %2552 = vrot.lane.b32.xlu0 %v2550_v52, %s4701_s19 }
 0xe9c   :  { %v2932_v53 = vpop.xlane.xlu0 %2931 }
 0xe9d   :  { %v2952_v24 = vsub.f32 %v4402_v54, %v2932_v53 }
 0xe9e   :  { %v2929_v35 = vpop.xlane.xlu1 %2928 }
 0xe9f   :  { %v2961_v58 = vmul.f32 1.442695, %v2952_v24  ;;  %v2951_v60 = vsub.f32 %v2645_v34, %v2929_v35 }
 0xea0   :  { %v2935_v42 = vpop.xlane.xlu0 %2934 }
 0xea1   :  { %4610 = vpow2.f32 %v2961_v58  ;;  %v2959_v5 = vmul.f32 1.442695, %v2951_v60  ;;  %v2953_v3 = vsub.f32 %v2736_v36, %v2935_v42 }
 0xea2   :  { %v2938_v7 = vpop.xlane.xlu1 %2937 }
 0xea3   :  { %4612 = vpow2.f32 %v2959_v5  ;;  %v2954_v9 = vsub.f32 %v4409_v11, %v2938_v7  ;;  %v2963_v19 = vmul.f32 1.442695, %v2953_v3 }
 0xea5   :  { %v2965_v31 = vmul.f32 1.442695, %v2954_v9 }
 0xea6   :  { %v2944_v29 = vpop.xlane.xlu1 %2943 }
 0xea7   :  { %4614 = vpow2.f32 %v2965_v31  ;;  %v2956_v20 = vsub.f32 %v4416_v40, %v2944_v29  ;;  %v2941_v57 = vpop.xlane.xlu0 %2940 }
 0xea8   :  { %4616 = vpow2.f32 %v2963_v19  ;;  %v2955_v61 = vsub.f32 %v2827_v16, %v2941_v57 }
 0xea9   :  { %v2969_v46 = vmul.f32 1.442695, %v2956_v20 }
 0xeaa   :  { %v2950_v56 = vpop.xlane.xlu1 %2949  ;;  %v2967_v27 = vmul.f32 1.442695, %v2955_v61 }
 0xeab   :  { %v2947_v21 = vpop.xlane.xlu0 %2946  ;;  %4618 = vpow2.f32 %v2969_v46  ;;  %v2958_v37 = vsub.f32 %v4423_v44, %v2950_v56 }
 0xeac   :  { %v2957_v22 = vsub.f32 %v2918_v33, %v2947_v21 }
 0xead   :  { %v2973_v30 = vmul.f32 1.442695, %v2958_v37 }
 0xeae   :  { %v4611_v25 = vpop.eup %4610  ;;  %v2971_v26 = vmul.f32 1.442695, %v2957_v22 }
 0xeaf   :  { %v2978_v2 = vsel %vm1054_vm11, %v4611_v25, 0.0  ;;  %v2553_v16 = vpop.permute.xlu0 %2552 }
 0xeb0   :  { %v4613_v28 = vpop.eup %4612  ;;  %4620 = vpow2.f32 %v2971_v26  ;;  %2979 = vadd.xlane.f32.xlu1 %v2978_v2  ;;  %v2557_v59 = vadd.f32 %v2553_v16, %v5428_v23  ;;  %v2556_v45 = vadd.f32 %v5414_v55, %v2553_v16  ;;  %v2555_v33 = vadd.f32 %v2553_v16, %v5420_v62 }
 0xeb1   :  { %4622 = vpow2.f32 %v2967_v27  ;;  %v2975_v39 = vsel %vm1054_vm11, %v4613_v28, 0.0  ;;  %v2558_v49 = vadd.f32 %v5424_v0, %v2553_v16  ;;  %v2560_v51 = vadd.f32 %v5433_v8, %v2553_v16 }
 0xeb2   :  { %4624 = vpow2.f32 %v2973_v30  ;;  %v2562_v23 = vadd.f32 %v5441_v63, %v2553_v16  ;;  %v2559_v55 = vadd.f32 %v2553_v16, %v5438_v12  ;;  %v2561_v62 = vadd.f32 %v2553_v16, %v5445_v18 }
 0xeb4   :  { %v4615_v48 = vpop.eup %4614  ;;  %2976 = vadd.xlane.f32.xlu1 %v2975_v39 }
 0xeb5   :  { %v2984_v47 = vsel %vm1054_vm11, %v4615_v48, 0.0  ;;  %v4617_v54 = vpop.eup %4616 }
 0xeb6   :  { %v2981_v11 = vsel %vm1054_vm11, %v4617_v54, 0.0 }
 0xeb8   :  { %2985 = vadd.xlane.f32.xlu1 %v2984_v47  ;;  %v5503_v32 = vpop.eup %4618 }
 0xeb9   :  { %v2990_v4 = vsel %vm1054_vm11, %v5503_v32, 0.0 }
 0xebc   :  { %2982 = vadd.xlane.f32.xlu1 %v2981_v11 }
 0xebd   :  { %v5505_v34 = vpop.eup %4620 }
 0xebe   :  { %v2993_v36 = vsel %vm1054_vm11, %v5505_v34, 0.0  ;;  %v5511_v6 = vpop.eup %4622 }
 0xebf   :  { %2994 = vadd.xlane.f32.xlu0 %v2993_v36  ;;  %v2987_v38 = vsel %vm1054_vm11, %v5511_v6, 0.0  ;;  %v5515_v40 = vpop.eup %4624 }
 0xec0   :  { %2991 = vadd.xlane.f32.xlu1 %v2990_v4  ;;  %v2996_v44 = vsel %vm1054_vm11, %v5515_v40, 0.0 }
 0xec4   :  { %2988 = vadd.xlane.f32.xlu1 %v2987_v38 }
 0xec8   :  { %2997 = vadd.xlane.f32.xlu1 %v2996_v44 }
 0xed5   :  { %3138 = vrot.lane.b32.xlu0 %v2557_v59, %s4701_s19 }
 0xed9   :  { %3059 = vrot.lane.b32.xlu1 %v2556_v45, %s4701_s19 }
 0xedd   :  { %3057 = vrot.lane.b32.xlu1 %v2555_v33, %s4701_s19 }
 0xee1   :  { %3140 = vrot.lane.b32.xlu1 %v2558_v49, %s4701_s19 }
 0xee5   :  { %3221 = vrot.lane.b32.xlu1 %v2560_v51, %s4701_s19 }
 0xee9   :  { %3302 = vrot.lane.b32.xlu1 %v2562_v23, %s4701_s19 }
 0xeed   :  { %3219 = vrot.lane.b32.xlu1 %v2559_v55, %s4701_s19 }
 0xef1   :  { %3300 = vrot.lane.b32.xlu1 %v2561_v62, %s4701_s19 }
 0xf39   :  { %v2980_v52 = vpop.xlane.xlu1 %2979 }
 0xf3a   :  { %4626 = vrcp.f32 %v2980_v52 }
 0xf3d   :  { %v2977_v0 = vpop.xlane.xlu1 %2976 }
 0xf3e   :  { %4628 = vrcp.f32 %v2977_v0 }
 0xf41   :  { %v2986_v53 = vpop.xlane.xlu1 %2985 }
 0xf42   :  { %4630 = vrcp.f32 %v2986_v53 }
 0xf45   :  { %v2983_v8 = vpop.xlane.xlu1 %2982 }
 0xf46   :  { %4632 = vrcp.f32 %v2983_v8 }
 0xf47   :  { %v4627_v24 = vpop.eup %4626 }
 0xf48   :  { %v3008_v35 = vmul.f32 %v4627_v24, %v4611_v25  ;;  %v2995_v58 = vpop.xlane.xlu0 %2994 }
 0xf49   :  { %v2992_v63 = vpop.xlane.xlu1 %2991 }
 0xf4a   :  { %4634 = vrcp.f32 %v2992_v63  ;;  %v3016_v18 = vsel %vm1054_vm11, %v3008_v35, 0.0 }
 0xf4b   :  { %v4629_v12 = vpop.eup %4628  ;;  %4636 = vrcp.f32 %v2995_v58 }
 0xf4c   :  { %v3007_v60 = vmul.f32 %v4629_v12, %v4613_v28 }
 0xf4d   :  { %v2989_v42 = vpop.xlane.xlu1 %2988 }
 0xf4e   :  { %v3015_v5 = vsel %vm1054_vm11, %v3007_v60, 0.0  ;;  %4638 = vrcp.f32 %v2989_v42 }
 0xf4f   :  { %v4631_v7 = vpop.eup %4630  ;;  %v3017_v3 = vadd.f32 %v3016_v18, %v3015_v5 }
 0xf50   :  { %v3010_v29 = vmul.f32 %v4631_v7, %v4615_v48 }
 0xf51   :  { %v2998_v9 = vpop.xlane.xlu1 %2997  ;;  %v3018_v31 = vrot.slane %v3017_v3, 4 }
 0xf52   :  { %4640 = vrcp.f32 %v2998_v9  ;;  %v3025_v21 = vsel %vm1054_vm11, %v3010_v29, 0.0  ;;  %v3920_v9 = vld [vmem:[%s5710_s12] ss:$0 sm:$0xff] }
 0xf53   :  { %v4633_v19 = vpop.eup %4632  ;;  %v3019_v20 = vadd.f32 %v3018_v31, %v3017_v3  ;;  %v1950_v29 = vadd.f32 %v3920_v9, %v5316_v17 }
 0xf54   :  { %v3009_v57 = vmul.f32 %v4633_v19, %v4617_v54 }
 0xf55   :  { %v3060_v46 = vpop.permute.xlu1 %3059  ;;  %v3020_v61 = vrot.slane %v3019_v20, 2 }
 0xf56   :  { %v3024_v56 = vsel %vm1054_vm11, %v3009_v57, 0.0  ;;  %4425 = vmatpush3.msra.mxu0 %v3060_v46  ;;  %v3991_v57 = vld [vmem:[%s5704_s6 + $0x10] sm:$0xff]  ;;  %v4653_v46 = vld [vmem:[%s5698_s0] sm:$0xf] }
 0xf57   :  { %v4635_v22 = vpop.eup %4634  ;;  %v3026_v25 = vadd.f32 %v3025_v21, %v3024_v56  ;;  %4426 = vmatprep.subr.mxu0 %v4702_v41  ;;  %v3021_v26 = vadd.f32 %v3020_v61, %v3019_v20  ;;  %v3992_v20 = vld [vmem:[%s5704_s6 + $0x18] sm:$0xff]  ;;  %v5580_v17 = vsub.f32 %v4653_v46, %v1950_v29  ;;  %v3988_v21 = vld [vmem:[%s5703_s5 + $0x30] sm:$0xff]  ;;  %v3987_v56 = vld [vmem:[%s5703_s5 + $0x28] sm:$0xff] }
 0xf58   :  { %v4637_v28 = vpop.eup %4636  ;;  %v3012_v30 = vmul.f32 %v4635_v22, %v5503_v32  ;;  %v3989_v61 = vld [vmem:[%s5703_s5 + $0x38] sm:$0xff] }
 0xf59   :  { %v3058_v27 = vpop.permute.xlu1 %3057  ;;  %v3022_v37 = vrot.slane %v3021_v26, 1  ;;  %v3027_v2 = vrot.slane %v3026_v25, 4  ;;  %v3013_v38 = vmul.f32 %v4637_v28, %v5505_v34  ;;  %v3997_v22 = vld [vmem:[%s5705_s7 + $0x38] sm:$0xff] }
 0xf5a   :  { %4427 = vmatpush3.msra.mxu0 %v3058_v27  ;;  %v3034_v44 = vsel %vm1054_vm11, %v3012_v30, 0.0  ;;  %v3995_v27 = vld [vmem:[%s5705_s7 + $0x28] sm:$0xff] }
 0xf5b   :  { %v4639_v39 = vpop.eup %4638  ;;  %4431 = vmatprep.subr.mxu0 %v4702_v41  ;;  %v3023_v48 = vadd.f32 %v3022_v37, %v3021_v26  ;;  %v3028_v47 = vadd.f32 %v3027_v2, %v3026_v25  ;;  %v3042_v23 = vsel %vm1054_vm11, %v3013_v38, 0.0  ;;  %v3986_v25 = vld [vmem:[%s5703_s5 + $0x20] sm:$0xff]  ;;  %v3996_v26 = vld [vmem:[%s5705_s7 + $0x30] sm:$0xff] }
 0xf5c   :  { %v3011_v54 = vmul.f32 %v4639_v39, %v5511_v6  ;;  %v3139_v6 = vpop.permute.xlu0 %3138  ;;  %v3994_v37 = vld [vmem:[%s5705_s7 + $0x20] sm:$0xff]  ;;  %s3850_s7 = sshll.u32 %s4705_s18, 4  ;;  %s3851_s7 = int_to_ptr.vmem [resolvable:$true] %s3850_s7 }
 0xf5d   :  { %v3141_v11 = vpop.permute.xlu1 %3140  ;;  %v3051_v36 = vmul.f32 0.0625, %v3023_v48  ;;  %v3029_v4 = vrot.slane %v3028_v47, 2 }
 0xf5e   :  { %v3033_v16 = vsel %vm1054_vm11, %v3011_v54, 0.0 }
 0xf5f   :  { %v4641_v59 = vpop.eup %4640  ;;  %v3035_v45 = vadd.f32 %v3034_v44, %v3033_v16  ;;  %4429 = vmatmul.mubr.msk.f32.vlgmr.msra.gmra.mxu0 %vm1054_vm11, %v3051_v36  ;;  %v3030_v32 = vadd.f32 %v3029_v4, %v3028_v47  ;;  %v5623_v36 = vld [vmem:[%s5708_s10 + $0x18] sm:$0xf] }
 0xf60   :  { %v3014_v33 = vmul.f32 %v4641_v59, %v5515_v40  ;;  %4432 = vmatpush3.msra.mxu0 %v3141_v11  ;;  %4435 = vmatprep.mubr.msk.f32.mxu0 %vm4703_vm12, %v4702_v41  ;;  %v3499_v16 = vrot.slane %v5623_v36, %v4938_v43  ;;  %v4654_v43 = vld [vmem:[%s5708_s10 + $0x10] sm:$0xff]  ;;  %v3486_v29 = vrot.slane %v5623_v36, %v4835_v15  ;;  %v4011_v15 = vld [vmem:[%s5710_s12 + $0x1] ss:$0 sm:$0xff]  ;;  %s4655_s12 = scalar_lea.vmem %s3841_s17, 64 }
 0xf61   :  { %4433 = vmatprep.subr.mxu0 %v4702_v41  ;;  %v3222_v49 = vpop.permute.xlu1 %3221  ;;  %v3031_v34 = vrot.slane %v3030_v32, 1  ;;  %v3036_v51 = vrot.slane %v3035_v45, 4  ;;  %p4656_p0 = scmp.ne.s32.totalorder %s3841_s17, %s4655_s12  ;;  %p4661_p2 = scmp.lt.s32.totalorder %s4655_s12, %s4655_s12 }
 0xf62   :  { %v3043_v55 = vsel %vm1054_vm11, %v3014_v33, 0.0  ;;  %4434 = vmatpush3.msra.mxu0 %v3139_v6  ;;  %4439 = vmatpush3.msra.mxu1 %v3222_v49 }
 0xf63   :  { %v3044_v62 = vadd.f32 %v3043_v55, %v3042_v23  ;;  %4445 = vmatprep.subr.mxu0 %v4702_v41  ;;  %v3032_v40 = vadd.f32 %v3031_v34, %v3030_v32  ;;  %4440 = vmatprep.subr.mxu1 %v4702_v41  ;;  %v3037_v52 = vadd.f32 %v3036_v51, %v3035_v45  ;;  %p4662_p3 = por %p4661_p2, %p4660_p1 }
 0xf64   :  { %v3387_v51 = vrot.slane %v4654_v43, %v1514_v1  ;;  %v4009_v1 = vld [vmem:[%s5707_s9 + $0x38] sm:$0xff] }
 0xf65   :  { %v3303_v0 = vpop.permute.xlu1 %3302  ;;  %v3052_v53 = vmul.f32 0.0625, %v3032_v40  ;;  %v3038_v8 = vrot.slane %v3037_v52, 2  ;;  %v3045_v24 = vrot.slane %v3044_v62, 4  ;;  %p4663_p4 = pnand %p4662_p3, %p4656_p0 }
 0xf67   :  { %4436 = vmatmul.mubr.msk.f32.vlgmr.msra.gmra.mxu0 %vm1054_vm11, %v3052_v53  ;;  %v3039_v63 = vadd.f32 %v3038_v8, %v3037_v52  ;;  %v3046_v35 = vadd.f32 %v3045_v24, %v3044_v62 }
 0xf68   :  { %4446 = vmatpush3.msra.mxu0 %v3303_v0  ;;  %4449 = vmatprep.mubr.msk.f32.mxu0 %vm4703_vm12, %v4702_v41 }
 0xf69   :  { %v3220_v58 = vpop.permute.xlu1 %3219  ;;  %4447 = vmatprep.subr.mxu0 %v4702_v41  ;;  %v3040_v12 = vrot.slane %v3039_v63, 1  ;;  %v3047_v60 = vrot.slane %v3046_v35, 2 }
 0xf6a   :  { %4441 = vmatpush3.msra.mxu1 %v3220_v58  ;;  %v4001_v58 = vld [vmem:[%s5706_s8 + $0x30] sm:$0xff] }
 0xf6b   :  { %v3041_v42 = vadd.f32 %v3040_v12, %v3039_v63  ;;  %v3048_v18 = vadd.f32 %v3047_v60, %v3046_v35  ;;  %4452 = vmatprep.subr.mxu1 %v4702_v41  ;;  %v4008_v12 = vld [vmem:[%s5707_s9 + $0x30] sm:$0xff]  ;;  %v4000_v60 = vld [vmem:[%s5706_s8 + $0x28] sm:$0xff] }
 0xf6d   :  { %v3301_v5 = vpop.permute.xlu1 %3300  ;;  %v3053_v7 = vmul.f32 0.0625, %v3041_v42  ;;  %v3049_v3 = vrot.slane %v3048_v18, 1  ;;  %v4007_v42 = vld [vmem:[%s5707_s9 + $0x28] sm:$0xff] }
 0xf6e   :  { %4448 = vmatpush3.msra.mxu0 %v3301_v5  ;;  %v4006_v5 = vld [vmem:[%s5707_s9 + $0x20] sm:$0xff] }
 0xf6f   :  { %4443 = vmatmul.mubr.msk.f32.vlgmr.msra.gmra.mxu1 %vm1054_vm11, %v3053_v7  ;;  %v3050_v31 = vadd.f32 %v3049_v3, %v3048_v18  ;;  %4463 = vmatprep.subr.mxu0 %v4702_v41  ;;  %v3999_v18 = vld [vmem:[%s5706_s8 + $0x20] sm:$0xff] }
 0xf70   :  { %4460 = vmatprep.mubr.msk.f32.mxu1 %vm4703_vm12, %v4702_v41  ;;  %4453 = vmatpush3.msra.mxu1 %v3989_v61 }
 0xf71   :  { %v3054_v19 = vmul.f32 0.0625, %v3050_v31  ;;  %4454 = vmatprep.subr.mxu1 %v4702_v41  ;;  %v3582_v31 = vrot.slane %v5623_v36, %v4941_v50  ;;  %v3918_v50 = vld [vmem:[%s5709_s11] ss:$0 sm:$0xff] }
 0xf72   :  { %4455 = vmatpush3.msra.mxu1 %v3988_v21 }
 0xf73   :  { %4450 = vmatmul.mubr.msk.f32.vlgmr.msra.gmra.mxu0 %vm1054_vm11, %v3054_v19  ;;  %4456 = vmatprep.subr.mxu1 %v4702_v41 }
 0xf74   :  { %4464 = vmatpush3.msra.mxu0 %v3992_v20  ;;  %4467 = vmatprep.mubr.msk.f32.mxu0 %vm4703_vm12, %v4702_v41  ;;  %v3491_v20 = vrot.slane %v5623_v36, %v4868_v10  ;;  %v1869_v10 = vadd.f32 %v3918_v50, %v5314_v13 }
 0xf75   :  { %4465 = vmatprep.subr.mxu0 %v4702_v41  ;;  %4457 = vmatpush3.msra.mxu1 %v3987_v56 }
 0xf76   :  { %4466 = vmatpush3.msra.mxu0 %v3991_v57  ;;  %4458 = vmatprep.subr.mxu1 %v4702_v41 }
 0xf77   :  { %4468 = vmatmul.mubr.msk.f32.vlgmr.msra.gmra.mxu0 %vm1054_vm11, %v5580_v17  ;;  %4470 = vmatprep.subr.mxu0 %v4702_v41 }
 0xf78   :  { %4478 = vmatprep.mubr.msk.f32.mxu0 %vm4703_vm12, %v4702_v41  ;;  %4471 = vmatpush3.msra.mxu0 %v3997_v22 }
 0xf79   :  { %4472 = vmatprep.subr.mxu0 %v4702_v41  ;;  %4459 = vmatpush3.msra.mxu1 %v3986_v25  ;;  %v4005_v25 = vld [vmem:[%s5709_s11 + $0x1] ss:$0 sm:$0xff] }
 0xf7a   :  { %4473 = vmatpush3.msra.mxu0 %v3996_v26  ;;  %4481 = vmatprep.subr.mxu1 %v4702_v41 }
 0xf7b   :  { %4474 = vmatprep.subr.mxu0 %v4702_v41 }
 0xf7c   :  { %4475 = vmatpush3.msra.mxu0 %v3995_v27 }
 0xf7d   :  { %4476 = vmatprep.subr.mxu0 %v4702_v41 }
 0xf7e   :  { %4477 = vmatpush3.msra.mxu0 %v3994_v37 }
 0xf7f   :  { %4492 = vmatprep.subr.mxu0 %v4702_v41 }
0x101f   :  { %v3132_v2 = vpop.f32.mrf.mxu0 }
0x1021   :  { %v4430_v28 = vpop.f32.mrf.mxu0 }
0x1027   :  { %v3213_v30 = vpop.f32.mrf.mxu0 }
0x1028   :  { %v3392_v47 = vrot.slane %v3213_v30, 7 }
0x1029   :  { %v4437_v39 = vpop.f32.mrf.mxu0 }
0x102a   :  { %v3393_v38 = vsel %vm1521_vm13, %v3392_v47, %v3132_v2 }
0x102f   :  { %v3294_v48 = vpop.f32.mrf.mxu1 }
0x1030   :  { %v3394_v54 = vrot.slane %v3294_v48, 6 }
0x1031   :  { %v4444_v11 = vpop.f32.mrf.mxu1 }
0x1032   :  { %v3395_v59 = vsel %vm1524_vm14, %v3394_v54, %v3393_v38 }
0x1033   :  { %v3375_v4 = vpop.f32.mrf.mxu0 }
0x1034   :  { %v3396_v44 = vrot.slane %v3375_v4, 5 }
0x1035   :  { %v4451_v45 = vpop.f32.mrf.mxu0 }
0x1036   :  { %v3397_v32 = vsel %vm1527_vm15, %v3396_v44, %v3395_v59 }
0x1037   :  { %4461 = vmatmul.mubr.msk.f32.vlgmr.msra.gmra.mxu1 %vm254_vm2, %v3397_v32  ;;  %v3569_v33 = vpop.f32.mrf.mxu0 }
0x1038   :  { %v3570_v6 = vadd.f32 %v3569_v33, %v3499_v16  ;;  %4489 = vmatprep.mubr.msk.f32.mxu1 %vm4703_vm12, %v4702_v41  ;;  %4482 = vmatpush3.msra.mxu1 %v4002_v14 }
0x1039   :  { %v4469_v49 = vpop.f32.mrf.mxu0  ;;  %4483 = vmatprep.subr.mxu1 %v4702_v41 }
0x103a   :  { %v3573_v34 = vmax.f32 %v3570_v6, 0.0  ;;  %4484 = vmatpush3.msra.mxu1 %v4001_v58 }
0x103b   :  { %4485 = vmatprep.subr.mxu1 %v4702_v41 }
0x103c   :  { %4479 = vmatmul.mubr.msk.f32.vlgmr.msra.gmra.mxu0 %vm254_vm2, %v3573_v34  ;;  %4486 = vmatpush3.msra.mxu1 %v4000_v60 }
0x103d   :  { %4500 = vmatprep.mubr.msk.f32.mxu0 %vm4703_vm12, %v4702_v41  ;;  %4493 = vmatpush3.msra.mxu0 %v4009_v1 }
0x103e   :  { %4494 = vmatprep.subr.mxu0 %v4702_v41  ;;  %4487 = vmatprep.subr.mxu1 %v4702_v41 }
0x103f   :  { %4495 = vmatpush3.msra.mxu0 %v4008_v12  ;;  %4488 = vmatpush3.msra.mxu1 %v3999_v18 }
0x1040   :  { %4496 = vmatprep.subr.mxu0 %v4702_v41 }
0x1041   :  { %4497 = vmatpush3.msra.mxu0 %v4007_v42 }
0x1042   :  { %4498 = vmatprep.subr.mxu0 %v4702_v41 }
0x1043   :  { %4499 = vmatpush3.msra.mxu0 %v4006_v5 }
0x10f7   :  { %v3466_v23 = vpop.f32.mrf.mxu1 }
0x10f8   :  { %v3467_v55 = vadd.f32 %v3466_v23, %v3387_v51 }
0x10f9   :  { %v4462_v62 = vpop.f32.mrf.mxu1 }
0x10fa   :  { %v3470_v40 = vsel %vm1601_vm3, %v3467_v55, 0.0 }
0x10fb   :  { %3471 = vadd.xlane.f32.xlu1 %v3470_v40 }
0x10fc   :  { %v3652_v52 = vpop.f32.mrf.mxu0 }
0x10fd   :  { %v3653_v57 = vadd.f32 %v3652_v52, %v3582_v31 }
0x10fe   :  { %v4480_v0 = vpop.f32.mrf.mxu0 }
0x10ff   :  { %v3656_v41 = vmax.f32 %v3653_v57, 0.0 }
0x1184   :  { %v3472_v53 = vpop.xlane.xlu1 %3471 }
0x1185   :  { %v3473_v8 = vmul.f32 0.03125, %v3472_v53 }
0x1187   :  { %v3474_v24 = vsub.f32 %v3467_v55, %v3473_v8 }
0x1189   :  { %v3475_v63 = vmul.f32 %v3474_v24, %v3474_v24 }
0x118b   :  { %v3476_v35 = vsel %vm1601_vm3, %v3475_v63, 0.0 }
0x118c   :  { %3477 = vadd.xlane.f32.xlu0 %v3476_v35 }
0x1215   :  { %v3478_v7 = vpop.xlane.xlu0 %3477 }
0x1216   :  { %v3479_v3 = vmul.f32 0.03125, %v3478_v7 }
0x1218   :  { %v3480_v9 = vadd.f32 1e-05, %v3479_v3 }
0x121a   :  { %4642 = vrsqrt.f32 %v3480_v9 }
0x1227   :  { %v4643_v19 = vpop.eup %4642 }
0x1228   :  { %v3482_v46 = vmul.f32 %v4643_v19, %v3474_v24 }
0x122a   :  { %v3487_v61 = vmul.f32 %v3486_v29, %v3482_v46 }
0x122c   :  { %v3492_v21 = vadd.f32 %v3491_v20, %v3487_v61 }
0x122e   :  { %v3657_v56 = vadd.f32 %v3656_v41, %v3492_v21 }
0x1230   :  { %4490 = vmatmul.mubr.msk.f32.vlgmr.msra.gmra.mxu1 %vm254_vm2, %v3657_v56  ;;  %4501 = vmatmul.mubr.msk.f32.vlgmr.msra.gmra.mxu0 %vm254_vm2, %v3657_v56  ;;  %vm3830_vm2 = vcmask 125952  }
0x12f0   :  { %v3732_v22 = vpop.f32.mrf.mxu1  ;;  %v3825_v26 = vpop.f32.mrf.mxu0 }
0x12f1   :  { %v3736_v27 = vadd.f32 %v3732_v22, %v1869_v10  ;;  %v3826_v37 = vadd.f32 %v4011_v15, %v3825_v26 }
0x12f2   :  { %v4491_v2 = vpop.f32.mrf.mxu1  ;;  %v4502_v28 = vpop.f32.mrf.mxu0 }
0x12f3   :  { %v3745_v30 = vadd.f32 %v4005_v25, %v3736_v27  ;;  %v3829_v39 = vsub.f32 %v5580_v17, %v3826_v37 }
0x12f5   :  { %3831 = vst.msk [vmem:[#allocation2] sm:$0xf] %vm3830_vm2, %v3829_v39 }
0x12f6   :  { %3833 = vst.msk [vmem:[#allocation4] sm:$0xf] %vm3832_vm10, %v3745_v30 }
0x12f7   :  { %4666 = shalt.err (!%p4663_p4)
}
0x12f8   :  { %3843 = dma.vmem_to_hbm [thread:$0]  %s3841_s17, 64, %s5711_s13, [#allocation3]  }
0x12f9   :  { %s4675_s28 = scalar_lea.vmem %s3851_s7, 64  ;;  %p4680_p6 = scmp.lt.s32.totalorder %s3851_s7, %s3851_s7 }
0x12fa   :  { %p4676_p5 = scmp.ne.s32.totalorder %s3851_s7, %s4675_s28  ;;  %p4681_p7 = scmp.lt.s32.totalorder %s4675_s28, %s4675_s28 }
0x12fc   :  { %p4682_p8 = por %p4681_p7, %p4680_p6 }
0x12fe   :  { %p4683_p9 = pnand %p4682_p8, %p4676_p5 }
0x1300   :  { %4686 = shalt.err (!%p4683_p9)
}
0x1301   :  { %3853 = dma.vmem_to_hbm [thread:$0]  %s3851_s7, 64, %s5712_s14, [#allocation5]  }
0x1302   :  { %4695 = dma.done.wait [#allocation3], 64  }
0x1303   :  { %4696 = vsyncadd [#allocation3], 4294967232 }
0x1304   :  { %4697 = dma.done.wait [#allocation5], 64  }
0x1305   :  { %4698 = vsyncadd [#allocation5], 4294967232 }
0x1306   :  { %3860 = vsyncpa [#allocation3], 1 }
0x1307   :  { %3861 = vsyncpa [#allocation5], 1 }

</bundles_post_ra>
